<compile_context>
chip_gen: v7x
topology: tpu7x:2x2x1
jax: 0.10.0
libtpu: 0.0.40
codegen_flags: <defaults>
</compile_context>

<pallas_src>
import jax
import jax.numpy as jnp
from jax.experimental import pallas as pl
from jax.experimental.pallas import tpu as pltpu

# ----------------------------- configuration ---------------------------------
B, C, IMG, PATCH = 2, 3, 16, 8          # 2x2 = 4 patches
NP = (IMG // PATCH) ** 2                # num patches = 4
S = NP + 1                              # sequence length with CLS = 5
D = 32                                  # hidden size
NH = 2                                  # attention heads
DH = D // NH                            # head dim = 16
MLP = 4 * D                             # MLP hidden = 128
LAYERS = 2
LN_EPS = 1e-12                          # HF ViT default
K_PATCH = C * PATCH * PATCH             # flattened patch size = 192


def _const_spec(shape):
    """Whole-array block, same block for every grid step (stays VMEM-resident)."""
    n = len(shape)
    return pl.BlockSpec(shape, lambda b, n=n: (0,) * n)


def _ln(x, g, b):
    mu = jnp.mean(x, axis=-1, keepdims=True)
    xc = x - mu
    var = jnp.mean(xc * xc, axis=-1, keepdims=True)
    return xc * jax.lax.rsqrt(var + LN_EPS) * g + b


# ----------------------------- fused Pallas kernel ----------------------------
def fused_vit_kernel(patches_ref, patch_w, patch_b, posc,
                     ln1g, ln1b, wq, bq, wk, bk, wv, bv, wo, bo,
                     ln2g, ln2b, w1, b1, w2, b2, lnf_g, lnf_b, o_ref):
    # --- patch embedding with folded CLS/pos ---
    # patches row 0 is all-zero, so emb[0] == patch_b; posc[0] = cls + pos[0] - patch_b,
    # hence h[0] == cls + pos[0] and h[1:] == patch_embed + pos[1:].
    emb = jnp.dot(patches_ref[0], patch_w[...],
                  preferred_element_type=jnp.float32) + patch_b[...]      # (S, D)
    h = emb + posc[...]                                                   # (S, D)

    scale = 1.0 / (DH ** 0.5)
    for li in range(LAYERS):                                              # static unroll
        # ---------------- multi-head self attention (heads batched) ----------------
        hn = _ln(h, ln1g[li], ln1b[li])                                   # (S, D)
        hb = jnp.broadcast_to(hn[None], (NH, S, D))                       # (NH, S, D)
        q = jnp.einsum('hsd,hde->hse', hb, wq[li],
                       preferred_element_type=jnp.float32) + bq[li]       # (NH, S, DH)
        k = jnp.einsum('hsd,hde->hse', hb, wk[li],
                       preferred_element_type=jnp.float32) + bk[li]       # (NH, S, DH)
        v = jnp.einsum('hsd,hde->hse', hb, wv[li],
                       preferred_element_type=jnp.float32) + bv[li]       # (NH, S, DH)

        s = jnp.einsum('hqd,hkd->hqk', q, k,
                       preferred_element_type=jnp.float32) * scale        # (NH, S, S)
        s = s - jnp.max(s, axis=-1, keepdims=True)
        e = jnp.exp(s)
        p = e * pl.reciprocal(jnp.sum(e, axis=-1, keepdims=True), approx=True)
        ctx = jnp.einsum('hqk,hkd->hqd', p, v,
                         preferred_element_type=jnp.float32)              # (NH, S, DH)

        # concat-then-project == sum over heads of per-head projections (head-major wo)
        proj = jnp.einsum('hsd,hde->hse', ctx, wo[li],
                          preferred_element_type=jnp.float32)             # (NH, S, D)
        attn = proj[0]
        for hh in range(1, NH):
            attn = attn + proj[hh]
        h = h + attn + bo[li]

        # ---------------- MLP ----------------
        h2 = _ln(h, ln2g[li], ln2b[li])
        m = jnp.dot(h2, w1[li], preferred_element_type=jnp.float32) + b1[li]   # (S, MLP)
        # TODO(synk): HF ViT default GELU is exact erf; tanh approximation used here.
        m = jax.nn.gelu(m, approximate=True)
        m = jnp.dot(m, w2[li], preferred_element_type=jnp.float32) + b2[li]    # (S, D)
        h = h + m

    # --- final LayerNorm -> last_hidden_state ---
    o_ref[0] = _ln(h, lnf_g[...], lnf_b[...])


# ----------------------------- glue (plain JAX, under jit) --------------------
def extract_patches(x):
    """x: (B, C, H, W) NCHW -> (B, num_patches, C*P*P), flattened in (C,P,P) order to
    match Conv2d(weight[D, C, P, P], stride=P) patch embedding."""
    b, c, h, w = x.shape
    nh, nw = h // PATCH, w // PATCH
    x = x.reshape(b, c, nh, PATCH, nw, PATCH)
    x = jnp.transpose(x, (0, 2, 4, 1, 3, 5))           # (B, nh, nw, C, P, P)
    return x.reshape(b, nh * nw, c * PATCH * PATCH)


def init_params(key):
    std = 0.02
    keys = jax.random.split(key, 9)
    conv_w = std * jax.random.normal(keys[0], (D, C, PATCH, PATCH), jnp.float32)
    kq, kk, kv, ko, k1, k2 = jax.random.split(keys[3], 6)
    return {
        'patch_w': conv_w.reshape(D, K_PATCH).T,                  # (K, D)
        'patch_b': jnp.zeros((1, D), jnp.float32),
        'cls': std * jax.random.normal(keys[1], (1, D), jnp.float32),
        'pos': std * jax.random.normal(keys[2], (S, D), jnp.float32),
        'lnf_g': jnp.ones((1, D), jnp.float32),
        'lnf_b': jnp.zeros((1, D), jnp.float32),
        # per-layer params stacked on a leading LAYERS axis; attention weights head-major
        'ln1g': jnp.ones((LAYERS, 1, D), jnp.float32),
        'ln1b': jnp.zeros((LAYERS, 1, D), jnp.float32),
        'wq': std * jax.random.normal(kq, (LAYERS, NH, D, DH), jnp.float32),
        'bq': jnp.zeros((LAYERS, NH, 1, DH), jnp.float32),
        'wk': std * jax.random.normal(kk, (LAYERS, NH, D, DH), jnp.float32),
        'bk': jnp.zeros((LAYERS, NH, 1, DH), jnp.float32),
        'wv': std * jax.random.normal(kv, (LAYERS, NH, D, DH), jnp.float32),
        'bv': jnp.zeros((LAYERS, NH, 1, DH), jnp.float32),
        'wo': std * jax.random.normal(ko, (LAYERS, NH, DH, D), jnp.float32),
        'bo': jnp.zeros((LAYERS, 1, D), jnp.float32),
        'ln2g': jnp.ones((LAYERS, 1, D), jnp.float32),
        'ln2b': jnp.zeros((LAYERS, 1, D), jnp.float32),
        'w1': std * jax.random.normal(k1, (LAYERS, D, MLP), jnp.float32),
        'b1': jnp.zeros((LAYERS, 1, MLP), jnp.float32),
        'w2': std * jax.random.normal(k2, (LAYERS, MLP, D), jnp.float32),
        'b2': jnp.zeros((LAYERS, 1, D), jnp.float32),
    }


@jax.jit
def model_without_head_forward(params, x):
    """Equivalent of ModelWithoutHead.forward: returns features(x).last_hidden_state."""
    b = x.shape[0]
    patches = extract_patches(x)                                          # (B, NP, K)
    # zero "virtual patch" row 0 -> CLS slot; its embedding is exactly patch_b,
    # which is cancelled inside posc row 0.
    patches = jnp.concatenate(
        [jnp.zeros((b, 1, K_PATCH), patches.dtype), patches], axis=1)     # (B, S, K)
    posc = params['pos'].at[0].add(params['cls'][0] - params['patch_b'][0])  # (S, D)

    weights = (params['patch_w'], params['patch_b'], posc,
               params['ln1g'], params['ln1b'],
               params['wq'], params['bq'], params['wk'], params['bk'],
               params['wv'], params['bv'], params['wo'], params['bo'],
               params['ln2g'], params['ln2b'],
               params['w1'], params['b1'], params['w2'], params['b2'],
               params['lnf_g'], params['lnf_b'])

    in_specs = [pl.BlockSpec((1, S, K_PATCH), lambda i: (i, 0, 0))]
    in_specs += [_const_spec(w.shape) for w in weights]

    return pl.pallas_call(
        fused_vit_kernel,
        out_shape=jax.ShapeDtypeStruct((b, S, D), jnp.float32),
        grid=(b,),
        in_specs=in_specs,
        out_specs=pl.BlockSpec((1, S, D), lambda i: (i, 0, 0)),
        compiler_params=pltpu.CompilerParams(
            dimension_semantics=("parallel",)),   # megacore sharding of batch on v7x
    )(patches, *weights)


# ----------------------------------- main -------------------------------------
if __name__ == "__main__":
    key = jax.random.PRNGKey(0)
    k_param, k_x = jax.random.split(key)
    params = init_params(k_param)
    x = jax.random.normal(k_x, (B, C, IMG, IMG), jnp.float32)   # NCHW, like PyTorch

    out = jax.block_until_ready(model_without_head_forward(params, x))

    assert out.shape == (B, S, D), out.shape
    assert out.dtype == jnp.float32
    assert bool(jnp.all(jnp.isfinite(out)))
    print("KERNEL_OK")
</pallas_src>

<mosaic_0001>
module attributes {stable_mosaic.version = 11 : i64} {
  func.func @fused_vit_kernel(%arg0: i32, %arg1: memref<1x5x192xf32, #tpu.memory_space<vmem>>, %arg2: memref<192x32xf32, #tpu.memory_space<vmem>>, %arg3: memref<1x32xf32, #tpu.memory_space<vmem>>, %arg4: memref<5x32xf32, #tpu.memory_space<vmem>>, %arg5: memref<2x1x32xf32, #tpu.memory_space<vmem>>, %arg6: memref<2x1x32xf32, #tpu.memory_space<vmem>>, %arg7: memref<2x2x32x16xf32, #tpu.memory_space<vmem>>, %arg8: memref<2x2x1x16xf32, #tpu.memory_space<vmem>>, %arg9: memref<2x2x32x16xf32, #tpu.memory_space<vmem>>, %arg10: memref<2x2x1x16xf32, #tpu.memory_space<vmem>>, %arg11: memref<2x2x32x16xf32, #tpu.memory_space<vmem>>, %arg12: memref<2x2x1x16xf32, #tpu.memory_space<vmem>>, %arg13: memref<2x2x16x32xf32, #tpu.memory_space<vmem>>, %arg14: memref<2x1x32xf32, #tpu.memory_space<vmem>>, %arg15: memref<2x1x32xf32, #tpu.memory_space<vmem>>, %arg16: memref<2x1x32xf32, #tpu.memory_space<vmem>>, %arg17: memref<2x32x128xf32, #tpu.memory_space<vmem>>, %arg18: memref<2x1x128xf32, #tpu.memory_space<vmem>>, %arg19: memref<2x128x32xf32, #tpu.memory_space<vmem>>, %arg20: memref<2x1x32xf32, #tpu.memory_space<vmem>>, %arg21: memref<1x32xf32, #tpu.memory_space<vmem>>, %arg22: memref<1x32xf32, #tpu.memory_space<vmem>>, %arg23: memref<1x5x32xf32, #tpu.memory_space<vmem>>) attributes {dimension_semantics = [#tpu.dimension_semantics<parallel>], iteration_bounds = array<i64: 2>, scalar_prefetch = 0 : i64, scratch_operands = 0 : i64, tpu.core_type = #tpu.core_type<tc>, window_params = [{transform_indices = @transform_0, window_bounds = array<i64: 1, 5, 192>}, {pipeline_mode = #tpu.pipeline_mode<synchronous>, transform_indices = @transform_1, window_bounds = array<i64: 192, 32>}, {pipeline_mode = #tpu.pipeline_mode<synchronous>, transform_indices = @transform_2, window_bounds = array<i64: 1, 32>}, {pipeline_mode = #tpu.pipeline_mode<synchronous>, transform_indices = @transform_3, window_bounds = array<i64: 5, 32>}, {pipeline_mode = #tpu.pipeline_mode<synchronous>, transform_indices = @transform_4, window_bounds = array<i64: 2, 1, 32>}, {pipeline_mode = #tpu.pipeline_mode<synchronous>, transform_indices = @transform_5, window_bounds = array<i64: 2, 1, 32>}, {pipeline_mode = #tpu.pipeline_mode<synchronous>, transform_indices = @transform_6, window_bounds = array<i64: 2, 2, 32, 16>}, {pipeline_mode = #tpu.pipeline_mode<synchronous>, transform_indices = @transform_7, window_bounds = array<i64: 2, 2, 1, 16>}, {pipeline_mode = #tpu.pipeline_mode<synchronous>, transform_indices = @transform_8, window_bounds = array<i64: 2, 2, 32, 16>}, {pipeline_mode = #tpu.pipeline_mode<synchronous>, transform_indices = @transform_9, window_bounds = array<i64: 2, 2, 1, 16>}, {pipeline_mode = #tpu.pipeline_mode<synchronous>, transform_indices = @transform_10, window_bounds = array<i64: 2, 2, 32, 16>}, {pipeline_mode = #tpu.pipeline_mode<synchronous>, transform_indices = @transform_11, window_bounds = array<i64: 2, 2, 1, 16>}, {pipeline_mode = #tpu.pipeline_mode<synchronous>, transform_indices = @transform_12, window_bounds = array<i64: 2, 2, 16, 32>}, {pipeline_mode = #tpu.pipeline_mode<synchronous>, transform_indices = @transform_13, window_bounds = array<i64: 2, 1, 32>}, {pipeline_mode = #tpu.pipeline_mode<synchronous>, transform_indices = @transform_14, window_bounds = array<i64: 2, 1, 32>}, {pipeline_mode = #tpu.pipeline_mode<synchronous>, transform_indices = @transform_15, window_bounds = array<i64: 2, 1, 32>}, {pipeline_mode = #tpu.pipeline_mode<synchronous>, transform_indices = @transform_16, window_bounds = array<i64: 2, 32, 128>}, {pipeline_mode = #tpu.pipeline_mode<synchronous>, transform_indices = @transform_17, window_bounds = array<i64: 2, 1, 128>}, {pipeline_mode = #tpu.pipeline_mode<synchronous>, transform_indices = @transform_18, window_bounds = array<i64: 2, 128, 32>}, {pipeline_mode = #tpu.pipeline_mode<synchronous>, transform_indices = @transform_19, window_bounds = array<i64: 2, 1, 32>}, {pipeline_mode = #tpu.pipeline_mode<synchronous>, transform_indices = @transform_20, window_bounds = array<i64: 1, 32>}, {pipeline_mode = #tpu.pipeline_mode<synchronous>, transform_indices = @transform_21, window_bounds = array<i64: 1, 32>}, {transform_indices = @transform_22, window_bounds = array<i64: 1, 5, 32>}]} {
    %c0 = arith.constant 0 : index
    %c0_0 = arith.constant 0 : index
    %c0_1 = arith.constant 0 : index
    %0 = vector.load %arg1[%c0, %c0_0, %c0_1] : memref<1x5x192xf32, #tpu.memory_space<vmem>>, vector<1x5x192xf32>
    %1 = vector.shape_cast %0 : vector<1x5x192xf32> to vector<5x192xf32>
    %c0_2 = arith.constant 0 : index
    %c0_3 = arith.constant 0 : index
    %2 = vector.load %arg2[%c0_2, %c0_3] : memref<192x32xf32, #tpu.memory_space<vmem>>, vector<192x32xf32>
    %cst = arith.constant dense<0.000000e+00> : vector<5x32xf32>
    %3 = tpu.matmul %1, %2, %cst {dimension_numbers = #tpu.dot_dimension_numbers<[1], [0], [0], [1], [0, 0, 1, 1], [], []>} : vector<5x192xf32>, vector<192x32xf32>, vector<5x32xf32> -> vector<5x32xf32>
    %c0_4 = arith.constant 0 : index
    %c0_5 = arith.constant 0 : index
    %4 = vector.load %arg3[%c0_4, %c0_5] : memref<1x32xf32, #tpu.memory_space<vmem>>, vector<1x32xf32>
    %5 = vector.broadcast %4 : vector<1x32xf32> to vector<5x32xf32>
    %6 = arith.addf %3, %5 : vector<5x32xf32>
    %c0_6 = arith.constant 0 : index
    %c0_7 = arith.constant 0 : index
    %7 = vector.load %arg4[%c0_6, %c0_7] : memref<5x32xf32, #tpu.memory_space<vmem>>, vector<5x32xf32>
    %8 = arith.addf %6, %7 : vector<5x32xf32>
    %c0_8 = arith.constant 0 : index
    %c0_9 = arith.constant 0 : index
    %c0_10 = arith.constant 0 : index
    %9 = vector.load %arg5[%c0_8, %c0_9, %c0_10] : memref<2x1x32xf32, #tpu.memory_space<vmem>>, vector<1x1x32xf32>
    %10 = vector.shape_cast %9 : vector<1x1x32xf32> to vector<1x32xf32>
    %c0_11 = arith.constant 0 : index
    %c0_12 = arith.constant 0 : index
    %c0_13 = arith.constant 0 : index
    %11 = vector.load %arg6[%c0_11, %c0_12, %c0_13] : memref<2x1x32xf32, #tpu.memory_space<vmem>>, vector<1x1x32xf32>
    %12 = vector.shape_cast %11 : vector<1x1x32xf32> to vector<1x32xf32>
    %cst_14 = arith.constant dense<0.000000e+00> : vector<5xf32>
    %13 = vector.multi_reduction <add>, %8, %cst_14 [1] : vector<5x32xf32> to vector<5xf32>
    %14 = vector.shape_cast %13 : vector<5xf32> to vector<5x1xf32>
    %cst_15 = arith.constant 3.200000e+01 : f32
    %15 = vector.broadcast %cst_15 : f32 to vector<5x1xf32>
    %16 = arith.divf %14, %15 : vector<5x1xf32>
    %17 = vector.broadcast %16 : vector<5x1xf32> to vector<5x32xf32>
    %18 = arith.subf %8, %17 : vector<5x32xf32>
    %19 = arith.mulf %18, %18 : vector<5x32xf32>
    %cst_16 = arith.constant dense<0.000000e+00> : vector<5xf32>
    %20 = vector.multi_reduction <add>, %19, %cst_16 [1] : vector<5x32xf32> to vector<5xf32>
    %21 = vector.shape_cast %20 : vector<5xf32> to vector<5x1xf32>
    %cst_17 = arith.constant 3.200000e+01 : f32
    %22 = vector.broadcast %cst_17 : f32 to vector<5x1xf32>
    %23 = arith.divf %21, %22 : vector<5x1xf32>
    %cst_18 = arith.constant 9.99999996E-13 : f32
    %24 = vector.broadcast %cst_18 : f32 to vector<5x1xf32>
    %25 = arith.addf %23, %24 : vector<5x1xf32>
    %26 = math.rsqrt %25 : vector<5x1xf32>
    %27 = vector.broadcast %26 : vector<5x1xf32> to vector<5x32xf32>
    %28 = arith.mulf %18, %27 : vector<5x32xf32>
    %29 = vector.broadcast %10 : vector<1x32xf32> to vector<5x32xf32>
    %30 = arith.mulf %28, %29 : vector<5x32xf32>
    %31 = vector.broadcast %12 : vector<1x32xf32> to vector<5x32xf32>
    %32 = arith.addf %30, %31 : vector<5x32xf32>
    %33 = vector.shape_cast %32 : vector<5x32xf32> to vector<1x5x32xf32>
    %34 = vector.shape_cast %33 : vector<1x5x32xf32> to vector<1x5x32xf32>
    %35 = vector.broadcast %34 : vector<1x5x32xf32> to vector<2x5x32xf32>
    %c0_19 = arith.constant 0 : index
    %c0_20 = arith.constant 0 : index
    %c0_21 = arith.constant 0 : index
    %c0_22 = arith.constant 0 : index
    %36 = vector.load %arg7[%c0_19, %c0_20, %c0_21, %c0_22] : memref<2x2x32x16xf32, #tpu.memory_space<vmem>>, vector<1x2x32x16xf32>
    %37 = vector.shape_cast %36 : vector<1x2x32x16xf32> to vector<2x32x16xf32>
    "tpu.trace_start"() <{level = 10 : i32, message = "hsd,hde->hse"}> : () -> ()
    %cst_23 = arith.constant dense<0.000000e+00> : vector<2x5x16xf32>
    %38 = tpu.matmul %35, %37, %cst_23 {dimension_numbers = #tpu.dot_dimension_numbers<[2], [1], [1], [2], [0, 0, 0, 1, 1, 2], [0], [0]>} : vector<2x5x32xf32>, vector<2x32x16xf32>, vector<2x5x16xf32> -> vector<2x5x16xf32>
    "tpu.trace_stop"() : () -> ()
    %c0_24 = arith.constant 0 : index
    %c0_25 = arith.constant 0 : index
    %c0_26 = arith.constant 0 : index
    %c0_27 = arith.constant 0 : index
    %39 = vector.load %arg8[%c0_24, %c0_25, %c0_26, %c0_27] : memref<2x2x1x16xf32, #tpu.memory_space<vmem>>, vector<1x2x1x16xf32>
    %40 = vector.shape_cast %39 : vector<1x2x1x16xf32> to vector<2x1x16xf32>
    %41 = vector.broadcast %40 : vector<2x1x16xf32> to vector<2x5x16xf32>
    %42 = arith.addf %38, %41 : vector<2x5x16xf32>
    %c0_28 = arith.constant 0 : index
    %c0_29 = arith.constant 0 : index
    %c0_30 = arith.constant 0 : index
    %c0_31 = arith.constant 0 : index
    %43 = vector.load %arg9[%c0_28, %c0_29, %c0_30, %c0_31] : memref<2x2x32x16xf32, #tpu.memory_space<vmem>>, vector<1x2x32x16xf32>
    %44 = vector.shape_cast %43 : vector<1x2x32x16xf32> to vector<2x32x16xf32>
    "tpu.trace_start"() <{level = 10 : i32, message = "hsd,hde->hse"}> : () -> ()
    %cst_32 = arith.constant dense<0.000000e+00> : vector<2x5x16xf32>
    %45 = tpu.matmul %35, %44, %cst_32 {dimension_numbers = #tpu.dot_dimension_numbers<[2], [1], [1], [2], [0, 0, 0, 1, 1, 2], [0], [0]>} : vector<2x5x32xf32>, vector<2x32x16xf32>, vector<2x5x16xf32> -> vector<2x5x16xf32>
    "tpu.trace_stop"() : () -> ()
    %c0_33 = arith.constant 0 : index
    %c0_34 = arith.constant 0 : index
    %c0_35 = arith.constant 0 : index
    %c0_36 = arith.constant 0 : index
    %46 = vector.load %arg10[%c0_33, %c0_34, %c0_35, %c0_36] : memref<2x2x1x16xf32, #tpu.memory_space<vmem>>, vector<1x2x1x16xf32>
    %47 = vector.shape_cast %46 : vector<1x2x1x16xf32> to vector<2x1x16xf32>
    %48 = vector.broadcast %47 : vector<2x1x16xf32> to vector<2x5x16xf32>
    %49 = arith.addf %45, %48 : vector<2x5x16xf32>
    %c0_37 = arith.constant 0 : index
    %c0_38 = arith.constant 0 : index
    %c0_39 = arith.constant 0 : index
    %c0_40 = arith.constant 0 : index
    %50 = vector.load %arg11[%c0_37, %c0_38, %c0_39, %c0_40] : memref<2x2x32x16xf32, #tpu.memory_space<vmem>>, vector<1x2x32x16xf32>
    %51 = vector.shape_cast %50 : vector<1x2x32x16xf32> to vector<2x32x16xf32>
    "tpu.trace_start"() <{level = 10 : i32, message = "hsd,hde->hse"}> : () -> ()
    %cst_41 = arith.constant dense<0.000000e+00> : vector<2x5x16xf32>
    %52 = tpu.matmul %35, %51, %cst_41 {dimension_numbers = #tpu.dot_dimension_numbers<[2], [1], [1], [2], [0, 0, 0, 1, 1, 2], [0], [0]>} : vector<2x5x32xf32>, vector<2x32x16xf32>, vector<2x5x16xf32> -> vector<2x5x16xf32>
    "tpu.trace_stop"() : () -> ()
    %c0_42 = arith.constant 0 : index
    %c0_43 = arith.constant 0 : index
    %c0_44 = arith.constant 0 : index
    %c0_45 = arith.constant 0 : index
    %53 = vector.load %arg12[%c0_42, %c0_43, %c0_44, %c0_45] : memref<2x2x1x16xf32, #tpu.memory_space<vmem>>, vector<1x2x1x16xf32>
    %54 = vector.shape_cast %53 : vector<1x2x1x16xf32> to vector<2x1x16xf32>
    %55 = vector.broadcast %54 : vector<2x1x16xf32> to vector<2x5x16xf32>
    %56 = arith.addf %52, %55 : vector<2x5x16xf32>
    "tpu.trace_start"() <{level = 10 : i32, message = "hqd,hkd->hqk"}> : () -> ()
    %cst_46 = arith.constant dense<0.000000e+00> : vector<2x5x5xf32>
    %57 = tpu.matmul %42, %49, %cst_46 {dimension_numbers = #tpu.dot_dimension_numbers<[2], [2], [1], [1], [0, 0, 0, 1, 1, 1], [0], [0]>} : vector<2x5x16xf32>, vector<2x5x16xf32>, vector<2x5x5xf32> -> vector<2x5x5xf32>
    "tpu.trace_stop"() : () -> ()
    %cst_47 = arith.constant 2.500000e-01 : f32
    %58 = vector.broadcast %cst_47 : f32 to vector<2x5x5xf32>
    %59 = arith.mulf %57, %58 : vector<2x5x5xf32>
    %cst_48 = arith.constant dense<0xFF800000> : vector<2x5xf32>
    %60 = vector.multi_reduction <maximumf>, %59, %cst_48 [2] : vector<2x5x5xf32> to vector<2x5xf32>
    %61 = vector.shape_cast %60 : vector<2x5xf32> to vector<2x5x1xf32>
    %62 = vector.broadcast %61 : vector<2x5x1xf32> to vector<2x5x5xf32>
    %63 = arith.subf %59, %62 : vector<2x5x5xf32>
    %64 = math.exp %63 : vector<2x5x5xf32>
    %cst_49 = arith.constant dense<0.000000e+00> : vector<2x5xf32>
    %65 = vector.multi_reduction <add>, %64, %cst_49 [2] : vector<2x5x5xf32> to vector<2x5xf32>
    %66 = vector.shape_cast %65 : vector<2x5xf32> to vector<2x5x1xf32>
    %67 = tpu.reciprocal %66 {approx = true} : vector<2x5x1xf32> -> vector<2x5x1xf32>
    %68 = vector.broadcast %67 : vector<2x5x1xf32> to vector<2x5x5xf32>
    %69 = arith.mulf %64, %68 : vector<2x5x5xf32>
    "tpu.trace_start"() <{level = 10 : i32, message = "hqk,hkd->hqd"}> : () -> ()
    %cst_50 = arith.constant dense<0.000000e+00> : vector<2x5x16xf32>
    %70 = tpu.matmul %69, %56, %cst_50 {dimension_numbers = #tpu.dot_dimension_numbers<[2], [1], [1], [2], [0, 0, 0, 1, 1, 2], [0], [0]>} : vector<2x5x5xf32>, vector<2x5x16xf32>, vector<2x5x16xf32> -> vector<2x5x16xf32>
    "tpu.trace_stop"() : () -> ()
    %c0_51 = arith.constant 0 : index
    %c0_52 = arith.constant 0 : index
    %c0_53 = arith.constant 0 : index
    %c0_54 = arith.constant 0 : index
    %71 = vector.load %arg13[%c0_51, %c0_52, %c0_53, %c0_54] : memref<2x2x16x32xf32, #tpu.memory_space<vmem>>, vector<1x2x16x32xf32>
    %72 = vector.shape_cast %71 : vector<1x2x16x32xf32> to vector<2x16x32xf32>
    "tpu.trace_start"() <{level = 10 : i32, message = "hsd,hde->hse"}> : () -> ()
    %cst_55 = arith.constant dense<0.000000e+00> : vector<2x5x32xf32>
    %73 = tpu.matmul %70, %72, %cst_55 {dimension_numbers = #tpu.dot_dimension_numbers<[2], [1], [1], [2], [0, 0, 0, 1, 1, 2], [0], [0]>} : vector<2x5x16xf32>, vector<2x16x32xf32>, vector<2x5x32xf32> -> vector<2x5x32xf32>
    "tpu.trace_stop"() : () -> ()
    %74 = vector.extract_strided_slice %73 {offsets = [0, 0, 0], sizes = [1, 5, 32], strides = [1, 1, 1]} : vector<2x5x32xf32> to vector<1x5x32xf32>
    %75 = vector.shape_cast %74 : vector<1x5x32xf32> to vector<5x32xf32>
    %76 = vector.extract_strided_slice %73 {offsets = [1, 0, 0], sizes = [1, 5, 32], strides = [1, 1, 1]} : vector<2x5x32xf32> to vector<1x5x32xf32>
    %77 = vector.shape_cast %76 : vector<1x5x32xf32> to vector<5x32xf32>
    %78 = arith.addf %75, %77 : vector<5x32xf32>
    %79 = arith.addf %8, %78 : vector<5x32xf32>
    %c0_56 = arith.constant 0 : index
    %c0_57 = arith.constant 0 : index
    %c0_58 = arith.constant 0 : index
    %80 = vector.load %arg14[%c0_56, %c0_57, %c0_58] : memref<2x1x32xf32, #tpu.memory_space<vmem>>, vector<1x1x32xf32>
    %81 = vector.shape_cast %80 : vector<1x1x32xf32> to vector<1x32xf32>
    %82 = vector.broadcast %81 : vector<1x32xf32> to vector<5x32xf32>
    %83 = arith.addf %79, %82 : vector<5x32xf32>
    %c0_59 = arith.constant 0 : index
    %c0_60 = arith.constant 0 : index
    %c0_61 = arith.constant 0 : index
    %84 = vector.load %arg15[%c0_59, %c0_60, %c0_61] : memref<2x1x32xf32, #tpu.memory_space<vmem>>, vector<1x1x32xf32>
    %85 = vector.shape_cast %84 : vector<1x1x32xf32> to vector<1x32xf32>
    %c0_62 = arith.constant 0 : index
    %c0_63 = arith.constant 0 : index
    %c0_64 = arith.constant 0 : index
    %86 = vector.load %arg16[%c0_62, %c0_63, %c0_64] : memref<2x1x32xf32, #tpu.memory_space<vmem>>, vector<1x1x32xf32>
    %87 = vector.shape_cast %86 : vector<1x1x32xf32> to vector<1x32xf32>
    %cst_65 = arith.constant dense<0.000000e+00> : vector<5xf32>
    %88 = vector.multi_reduction <add>, %83, %cst_65 [1] : vector<5x32xf32> to vector<5xf32>
    %89 = vector.shape_cast %88 : vector<5xf32> to vector<5x1xf32>
    %cst_66 = arith.constant 3.200000e+01 : f32
    %90 = vector.broadcast %cst_66 : f32 to vector<5x1xf32>
    %91 = arith.divf %89, %90 : vector<5x1xf32>
    %92 = vector.broadcast %91 : vector<5x1xf32> to vector<5x32xf32>
    %93 = arith.subf %83, %92 : vector<5x32xf32>
    %94 = arith.mulf %93, %93 : vector<5x32xf32>
    %cst_67 = arith.constant dense<0.000000e+00> : vector<5xf32>
    %95 = vector.multi_reduction <add>, %94, %cst_67 [1] : vector<5x32xf32> to vector<5xf32>
    %96 = vector.shape_cast %95 : vector<5xf32> to vector<5x1xf32>
    %cst_68 = arith.constant 3.200000e+01 : f32
    %97 = vector.broadcast %cst_68 : f32 to vector<5x1xf32>
    %98 = arith.divf %96, %97 : vector<5x1xf32>
    %cst_69 = arith.constant 9.99999996E-13 : f32
    %99 = vector.broadcast %cst_69 : f32 to vector<5x1xf32>
    %100 = arith.addf %98, %99 : vector<5x1xf32>
    %101 = math.rsqrt %100 : vector<5x1xf32>
    %102 = vector.broadcast %101 : vector<5x1xf32> to vector<5x32xf32>
    %103 = arith.mulf %93, %102 : vector<5x32xf32>
    %104 = vector.broadcast %85 : vector<1x32xf32> to vector<5x32xf32>
    %105 = arith.mulf %103, %104 : vector<5x32xf32>
    %106 = vector.broadcast %87 : vector<1x32xf32> to vector<5x32xf32>
    %107 = arith.addf %105, %106 : vector<5x32xf32>
    %c0_70 = arith.constant 0 : index
    %c0_71 = arith.constant 0 : index
    %c0_72 = arith.constant 0 : index
    %108 = vector.load %arg17[%c0_70, %c0_71, %c0_72] : memref<2x32x128xf32, #tpu.memory_space<vmem>>, vector<1x32x128xf32>
    %109 = vector.shape_cast %108 : vector<1x32x128xf32> to vector<32x128xf32>
    %cst_73 = arith.constant dense<0.000000e+00> : vector<5x128xf32>
    %110 = tpu.matmul %107, %109, %cst_73 {dimension_numbers = #tpu.dot_dimension_numbers<[1], [0], [0], [1], [0, 0, 1, 1], [], []>} : vector<5x32xf32>, vector<32x128xf32>, vector<5x128xf32> -> vector<5x128xf32>
    %c0_74 = arith.constant 0 : index
    %c0_75 = arith.constant 0 : index
    %c0_76 = arith.constant 0 : index
    %111 = vector.load %arg18[%c0_74, %c0_75, %c0_76] : memref<2x1x128xf32, #tpu.memory_space<vmem>>, vector<1x1x128xf32>
    %112 = vector.shape_cast %111 : vector<1x1x128xf32> to vector<1x128xf32>
    %113 = vector.broadcast %112 : vector<1x128xf32> to vector<5x128xf32>
    %114 = arith.addf %110, %113 : vector<5x128xf32>
    %115 = arith.mulf %114, %114 : vector<5x128xf32>
    %116 = arith.mulf %114, %115 : vector<5x128xf32>
    %cst_77 = arith.constant 4.471500e-02 : f32
    %117 = vector.broadcast %cst_77 : f32 to vector<5x128xf32>
    %118 = arith.mulf %117, %116 : vector<5x128xf32>
    %119 = arith.addf %114, %118 : vector<5x128xf32>
    %cst_78 = arith.constant 0.797884583 : f32
    %120 = vector.broadcast %cst_78 : f32 to vector<5x128xf32>
    %121 = arith.mulf %120, %119 : vector<5x128xf32>
    %122 = math.tanh %121 : vector<5x128xf32>
    %cst_79 = arith.constant 1.000000e+00 : f32
    %123 = vector.broadcast %cst_79 : f32 to vector<5x128xf32>
    %124 = arith.addf %123, %122 : vector<5x128xf32>
    %cst_80 = arith.constant 5.000000e-01 : f32
    %125 = vector.broadcast %cst_80 : f32 to vector<5x128xf32>
    %126 = arith.mulf %125, %124 : vector<5x128xf32>
    %127 = arith.mulf %114, %126 : vector<5x128xf32>
    %c0_81 = arith.constant 0 : index
    %c0_82 = arith.constant 0 : index
    %c0_83 = arith.constant 0 : index
    %128 = vector.load %arg19[%c0_81, %c0_82, %c0_83] : memref<2x128x32xf32, #tpu.memory_space<vmem>>, vector<1x128x32xf32>
    %129 = vector.shape_cast %128 : vector<1x128x32xf32> to vector<128x32xf32>
    %cst_84 = arith.constant dense<0.000000e+00> : vector<5x32xf32>
    %130 = tpu.matmul %127, %129, %cst_84 {dimension_numbers = #tpu.dot_dimension_numbers<[1], [0], [0], [1], [0, 0, 1, 1], [], []>} : vector<5x128xf32>, vector<128x32xf32>, vector<5x32xf32> -> vector<5x32xf32>
    %c0_85 = arith.constant 0 : index
    %c0_86 = arith.constant 0 : index
    %c0_87 = arith.constant 0 : index
    %131 = vector.load %arg20[%c0_85, %c0_86, %c0_87] : memref<2x1x32xf32, #tpu.memory_space<vmem>>, vector<1x1x32xf32>
    %132 = vector.shape_cast %131 : vector<1x1x32xf32> to vector<1x32xf32>
    %133 = vector.broadcast %132 : vector<1x32xf32> to vector<5x32xf32>
    %134 = arith.addf %130, %133 : vector<5x32xf32>
    %135 = arith.addf %83, %134 : vector<5x32xf32>
    %c1 = arith.constant 1 : index
    %c0_88 = arith.constant 0 : index
    %c0_89 = arith.constant 0 : index
    %136 = vector.load %arg5[%c1, %c0_88, %c0_89] : memref<2x1x32xf32, #tpu.memory_space<vmem>>, vector<1x1x32xf32>
    %137 = vector.shape_cast %136 : vector<1x1x32xf32> to vector<1x32xf32>
    %c1_90 = arith.constant 1 : index
    %c0_91 = arith.constant 0 : index
    %c0_92 = arith.constant 0 : index
    %138 = vector.load %arg6[%c1_90, %c0_91, %c0_92] : memref<2x1x32xf32, #tpu.memory_space<vmem>>, vector<1x1x32xf32>
    %139 = vector.shape_cast %138 : vector<1x1x32xf32> to vector<1x32xf32>
    %cst_93 = arith.constant dense<0.000000e+00> : vector<5xf32>
    %140 = vector.multi_reduction <add>, %135, %cst_93 [1] : vector<5x32xf32> to vector<5xf32>
    %141 = vector.shape_cast %140 : vector<5xf32> to vector<5x1xf32>
    %cst_94 = arith.constant 3.200000e+01 : f32
    %142 = vector.broadcast %cst_94 : f32 to vector<5x1xf32>
    %143 = arith.divf %141, %142 : vector<5x1xf32>
    %144 = vector.broadcast %143 : vector<5x1xf32> to vector<5x32xf32>
    %145 = arith.subf %135, %144 : vector<5x32xf32>
    %146 = arith.mulf %145, %145 : vector<5x32xf32>
    %cst_95 = arith.constant dense<0.000000e+00> : vector<5xf32>
    %147 = vector.multi_reduction <add>, %146, %cst_95 [1] : vector<5x32xf32> to vector<5xf32>
    %148 = vector.shape_cast %147 : vector<5xf32> to vector<5x1xf32>
    %cst_96 = arith.constant 3.200000e+01 : f32
    %149 = vector.broadcast %cst_96 : f32 to vector<5x1xf32>
    %150 = arith.divf %148, %149 : vector<5x1xf32>
    %cst_97 = arith.constant 9.99999996E-13 : f32
    %151 = vector.broadcast %cst_97 : f32 to vector<5x1xf32>
    %152 = arith.addf %150, %151 : vector<5x1xf32>
    %153 = math.rsqrt %152 : vector<5x1xf32>
    %154 = vector.broadcast %153 : vector<5x1xf32> to vector<5x32xf32>
    %155 = arith.mulf %145, %154 : vector<5x32xf32>
    %156 = vector.broadcast %137 : vector<1x32xf32> to vector<5x32xf32>
    %157 = arith.mulf %155, %156 : vector<5x32xf32>
    %158 = vector.broadcast %139 : vector<1x32xf32> to vector<5x32xf32>
    %159 = arith.addf %157, %158 : vector<5x32xf32>
    %160 = vector.shape_cast %159 : vector<5x32xf32> to vector<1x5x32xf32>
    %161 = vector.shape_cast %160 : vector<1x5x32xf32> to vector<1x5x32xf32>
    %162 = vector.broadcast %161 : vector<1x5x32xf32> to vector<2x5x32xf32>
    %c1_98 = arith.constant 1 : index
    %c0_99 = arith.constant 0 : index
    %c0_100 = arith.constant 0 : index
    %c0_101 = arith.constant 0 : index
    %163 = vector.load %arg7[%c1_98, %c0_99, %c0_100, %c0_101] : memref<2x2x32x16xf32, #tpu.memory_space<vmem>>, vector<1x2x32x16xf32>
    %164 = vector.shape_cast %163 : vector<1x2x32x16xf32> to vector<2x32x16xf32>
    "tpu.trace_start"() <{level = 10 : i32, message = "hsd,hde->hse"}> : () -> ()
    %cst_102 = arith.constant dense<0.000000e+00> : vector<2x5x16xf32>
    %165 = tpu.matmul %162, %164, %cst_102 {dimension_numbers = #tpu.dot_dimension_numbers<[2], [1], [1], [2], [0, 0, 0, 1, 1, 2], [0], [0]>} : vector<2x5x32xf32>, vector<2x32x16xf32>, vector<2x5x16xf32> -> vector<2x5x16xf32>
    "tpu.trace_stop"() : () -> ()
    %c1_103 = arith.constant 1 : index
    %c0_104 = arith.constant 0 : index
    %c0_105 = arith.constant 0 : index
    %c0_106 = arith.constant 0 : index
    %166 = vector.load %arg8[%c1_103, %c0_104, %c0_105, %c0_106] : memref<2x2x1x16xf32, #tpu.memory_space<vmem>>, vector<1x2x1x16xf32>
    %167 = vector.shape_cast %166 : vector<1x2x1x16xf32> to vector<2x1x16xf32>
    %168 = vector.broadcast %167 : vector<2x1x16xf32> to vector<2x5x16xf32>
    %169 = arith.addf %165, %168 : vector<2x5x16xf32>
    %c1_107 = arith.constant 1 : index
    %c0_108 = arith.constant 0 : index
    %c0_109 = arith.constant 0 : index
    %c0_110 = arith.constant 0 : index
    %170 = vector.load %arg9[%c1_107, %c0_108, %c0_109, %c0_110] : memref<2x2x32x16xf32, #tpu.memory_space<vmem>>, vector<1x2x32x16xf32>
    %171 = vector.shape_cast %170 : vector<1x2x32x16xf32> to vector<2x32x16xf32>
    "tpu.trace_start"() <{level = 10 : i32, message = "hsd,hde->hse"}> : () -> ()
    %cst_111 = arith.constant dense<0.000000e+00> : vector<2x5x16xf32>
    %172 = tpu.matmul %162, %171, %cst_111 {dimension_numbers = #tpu.dot_dimension_numbers<[2], [1], [1], [2], [0, 0, 0, 1, 1, 2], [0], [0]>} : vector<2x5x32xf32>, vector<2x32x16xf32>, vector<2x5x16xf32> -> vector<2x5x16xf32>
    "tpu.trace_stop"() : () -> ()
    %c1_112 = arith.constant 1 : index
    %c0_113 = arith.constant 0 : index
    %c0_114 = arith.constant 0 : index
    %c0_115 = arith.constant 0 : index
    %173 = vector.load %arg10[%c1_112, %c0_113, %c0_114, %c0_115] : memref<2x2x1x16xf32, #tpu.memory_space<vmem>>, vector<1x2x1x16xf32>
    %174 = vector.shape_cast %173 : vector<1x2x1x16xf32> to vector<2x1x16xf32>
    %175 = vector.broadcast %174 : vector<2x1x16xf32> to vector<2x5x16xf32>
    %176 = arith.addf %172, %175 : vector<2x5x16xf32>
    %c1_116 = arith.constant 1 : index
    %c0_117 = arith.constant 0 : index
    %c0_118 = arith.constant 0 : index
    %c0_119 = arith.constant 0 : index
    %177 = vector.load %arg11[%c1_116, %c0_117, %c0_118, %c0_119] : memref<2x2x32x16xf32, #tpu.memory_space<vmem>>, vector<1x2x32x16xf32>
    %178 = vector.shape_cast %177 : vector<1x2x32x16xf32> to vector<2x32x16xf32>
    "tpu.trace_start"() <{level = 10 : i32, message = "hsd,hde->hse"}> : () -> ()
    %cst_120 = arith.constant dense<0.000000e+00> : vector<2x5x16xf32>
    %179 = tpu.matmul %162, %178, %cst_120 {dimension_numbers = #tpu.dot_dimension_numbers<[2], [1], [1], [2], [0, 0, 0, 1, 1, 2], [0], [0]>} : vector<2x5x32xf32>, vector<2x32x16xf32>, vector<2x5x16xf32> -> vector<2x5x16xf32>
    "tpu.trace_stop"() : () -> ()
    %c1_121 = arith.constant 1 : index
    %c0_122 = arith.constant 0 : index
    %c0_123 = arith.constant 0 : index
    %c0_124 = arith.constant 0 : index
    %180 = vector.load %arg12[%c1_121, %c0_122, %c0_123, %c0_124] : memref<2x2x1x16xf32, #tpu.memory_space<vmem>>, vector<1x2x1x16xf32>
    %181 = vector.shape_cast %180 : vector<1x2x1x16xf32> to vector<2x1x16xf32>
    %182 = vector.broadcast %181 : vector<2x1x16xf32> to vector<2x5x16xf32>
    %183 = arith.addf %179, %182 : vector<2x5x16xf32>
    "tpu.trace_start"() <{level = 10 : i32, message = "hqd,hkd->hqk"}> : () -> ()
    %cst_125 = arith.constant dense<0.000000e+00> : vector<2x5x5xf32>
    %184 = tpu.matmul %169, %176, %cst_125 {dimension_numbers = #tpu.dot_dimension_numbers<[2], [2], [1], [1], [0, 0, 0, 1, 1, 1], [0], [0]>} : vector<2x5x16xf32>, vector<2x5x16xf32>, vector<2x5x5xf32> -> vector<2x5x5xf32>
    "tpu.trace_stop"() : () -> ()
    %cst_126 = arith.constant 2.500000e-01 : f32
    %185 = vector.broadcast %cst_126 : f32 to vector<2x5x5xf32>
    %186 = arith.mulf %184, %185 : vector<2x5x5xf32>
    %cst_127 = arith.constant dense<0xFF800000> : vector<2x5xf32>
    %187 = vector.multi_reduction <maximumf>, %186, %cst_127 [2] : vector<2x5x5xf32> to vector<2x5xf32>
    %188 = vector.shape_cast %187 : vector<2x5xf32> to vector<2x5x1xf32>
    %189 = vector.broadcast %188 : vector<2x5x1xf32> to vector<2x5x5xf32>
    %190 = arith.subf %186, %189 : vector<2x5x5xf32>
    %191 = math.exp %190 : vector<2x5x5xf32>
    %cst_128 = arith.constant dense<0.000000e+00> : vector<2x5xf32>
    %192 = vector.multi_reduction <add>, %191, %cst_128 [2] : vector<2x5x5xf32> to vector<2x5xf32>
    %193 = vector.shape_cast %192 : vector<2x5xf32> to vector<2x5x1xf32>
    %194 = tpu.reciprocal %193 {approx = true} : vector<2x5x1xf32> -> vector<2x5x1xf32>
    %195 = vector.broadcast %194 : vector<2x5x1xf32> to vector<2x5x5xf32>
    %196 = arith.mulf %191, %195 : vector<2x5x5xf32>
    "tpu.trace_start"() <{level = 10 : i32, message = "hqk,hkd->hqd"}> : () -> ()
    %cst_129 = arith.constant dense<0.000000e+00> : vector<2x5x16xf32>
    %197 = tpu.matmul %196, %183, %cst_129 {dimension_numbers = #tpu.dot_dimension_numbers<[2], [1], [1], [2], [0, 0, 0, 1, 1, 2], [0], [0]>} : vector<2x5x5xf32>, vector<2x5x16xf32>, vector<2x5x16xf32> -> vector<2x5x16xf32>
    "tpu.trace_stop"() : () -> ()
    %c1_130 = arith.constant 1 : index
    %c0_131 = arith.constant 0 : index
    %c0_132 = arith.constant 0 : index
    %c0_133 = arith.constant 0 : index
    %198 = vector.load %arg13[%c1_130, %c0_131, %c0_132, %c0_133] : memref<2x2x16x32xf32, #tpu.memory_space<vmem>>, vector<1x2x16x32xf32>
    %199 = vector.shape_cast %198 : vector<1x2x16x32xf32> to vector<2x16x32xf32>
    "tpu.trace_start"() <{level = 10 : i32, message = "hsd,hde->hse"}> : () -> ()
    %cst_134 = arith.constant dense<0.000000e+00> : vector<2x5x32xf32>
    %200 = tpu.matmul %197, %199, %cst_134 {dimension_numbers = #tpu.dot_dimension_numbers<[2], [1], [1], [2], [0, 0, 0, 1, 1, 2], [0], [0]>} : vector<2x5x16xf32>, vector<2x16x32xf32>, vector<2x5x32xf32> -> vector<2x5x32xf32>
    "tpu.trace_stop"() : () -> ()
    %201 = vector.extract_strided_slice %200 {offsets = [0, 0, 0], sizes = [1, 5, 32], strides = [1, 1, 1]} : vector<2x5x32xf32> to vector<1x5x32xf32>
    %202 = vector.shape_cast %201 : vector<1x5x32xf32> to vector<5x32xf32>
    %203 = vector.extract_strided_slice %200 {offsets = [1, 0, 0], sizes = [1, 5, 32], strides = [1, 1, 1]} : vector<2x5x32xf32> to vector<1x5x32xf32>
    %204 = vector.shape_cast %203 : vector<1x5x32xf32> to vector<5x32xf32>
    %205 = arith.addf %202, %204 : vector<5x32xf32>
    %206 = arith.addf %135, %205 : vector<5x32xf32>
    %c1_135 = arith.constant 1 : index
    %c0_136 = arith.constant 0 : index
    %c0_137 = arith.constant 0 : index
    %207 = vector.load %arg14[%c1_135, %c0_136, %c0_137] : memref<2x1x32xf32, #tpu.memory_space<vmem>>, vector<1x1x32xf32>
    %208 = vector.shape_cast %207 : vector<1x1x32xf32> to vector<1x32xf32>
    %209 = vector.broadcast %208 : vector<1x32xf32> to vector<5x32xf32>
    %210 = arith.addf %206, %209 : vector<5x32xf32>
    %c1_138 = arith.constant 1 : index
    %c0_139 = arith.constant 0 : index
    %c0_140 = arith.constant 0 : index
    %211 = vector.load %arg15[%c1_138, %c0_139, %c0_140] : memref<2x1x32xf32, #tpu.memory_space<vmem>>, vector<1x1x32xf32>
    %212 = vector.shape_cast %211 : vector<1x1x32xf32> to vector<1x32xf32>
    %c1_141 = arith.constant 1 : index
    %c0_142 = arith.constant 0 : index
    %c0_143 = arith.constant 0 : index
    %213 = vector.load %arg16[%c1_141, %c0_142, %c0_143] : memref<2x1x32xf32, #tpu.memory_space<vmem>>, vector<1x1x32xf32>
    %214 = vector.shape_cast %213 : vector<1x1x32xf32> to vector<1x32xf32>
    %cst_144 = arith.constant dense<0.000000e+00> : vector<5xf32>
    %215 = vector.multi_reduction <add>, %210, %cst_144 [1] : vector<5x32xf32> to vector<5xf32>
    %216 = vector.shape_cast %215 : vector<5xf32> to vector<5x1xf32>
    %cst_145 = arith.constant 3.200000e+01 : f32
    %217 = vector.broadcast %cst_145 : f32 to vector<5x1xf32>
    %218 = arith.divf %216, %217 : vector<5x1xf32>
    %219 = vector.broadcast %218 : vector<5x1xf32> to vector<5x32xf32>
    %220 = arith.subf %210, %219 : vector<5x32xf32>
    %221 = arith.mulf %220, %220 : vector<5x32xf32>
    %cst_146 = arith.constant dense<0.000000e+00> : vector<5xf32>
    %222 = vector.multi_reduction <add>, %221, %cst_146 [1] : vector<5x32xf32> to vector<5xf32>
    %223 = vector.shape_cast %222 : vector<5xf32> to vector<5x1xf32>
    %cst_147 = arith.constant 3.200000e+01 : f32
    %224 = vector.broadcast %cst_147 : f32 to vector<5x1xf32>
    %225 = arith.divf %223, %224 : vector<5x1xf32>
    %cst_148 = arith.constant 9.99999996E-13 : f32
    %226 = vector.broadcast %cst_148 : f32 to vector<5x1xf32>
    %227 = arith.addf %225, %226 : vector<5x1xf32>
    %228 = math.rsqrt %227 : vector<5x1xf32>
    %229 = vector.broadcast %228 : vector<5x1xf32> to vector<5x32xf32>
    %230 = arith.mulf %220, %229 : vector<5x32xf32>
    %231 = vector.broadcast %212 : vector<1x32xf32> to vector<5x32xf32>
    %232 = arith.mulf %230, %231 : vector<5x32xf32>
    %233 = vector.broadcast %214 : vector<1x32xf32> to vector<5x32xf32>
    %234 = arith.addf %232, %233 : vector<5x32xf32>
    %c1_149 = arith.constant 1 : index
    %c0_150 = arith.constant 0 : index
    %c0_151 = arith.constant 0 : index
    %235 = vector.load %arg17[%c1_149, %c0_150, %c0_151] : memref<2x32x128xf32, #tpu.memory_space<vmem>>, vector<1x32x128xf32>
    %236 = vector.shape_cast %235 : vector<1x32x128xf32> to vector<32x128xf32>
    %cst_152 = arith.constant dense<0.000000e+00> : vector<5x128xf32>
    %237 = tpu.matmul %234, %236, %cst_152 {dimension_numbers = #tpu.dot_dimension_numbers<[1], [0], [0], [1], [0, 0, 1, 1], [], []>} : vector<5x32xf32>, vector<32x128xf32>, vector<5x128xf32> -> vector<5x128xf32>
    %c1_153 = arith.constant 1 : index
    %c0_154 = arith.constant 0 : index
    %c0_155 = arith.constant 0 : index
    %238 = vector.load %arg18[%c1_153, %c0_154, %c0_155] : memref<2x1x128xf32, #tpu.memory_space<vmem>>, vector<1x1x128xf32>
    %239 = vector.shape_cast %238 : vector<1x1x128xf32> to vector<1x128xf32>
    %240 = vector.broadcast %239 : vector<1x128xf32> to vector<5x128xf32>
    %241 = arith.addf %237, %240 : vector<5x128xf32>
    %242 = arith.mulf %241, %241 : vector<5x128xf32>
    %243 = arith.mulf %241, %242 : vector<5x128xf32>
    %cst_156 = arith.constant 4.471500e-02 : f32
    %244 = vector.broadcast %cst_156 : f32 to vector<5x128xf32>
    %245 = arith.mulf %244, %243 : vector<5x128xf32>
    %246 = arith.addf %241, %245 : vector<5x128xf32>
    %cst_157 = arith.constant 0.797884583 : f32
    %247 = vector.broadcast %cst_157 : f32 to vector<5x128xf32>
    %248 = arith.mulf %247, %246 : vector<5x128xf32>
    %249 = math.tanh %248 : vector<5x128xf32>
    %cst_158 = arith.constant 1.000000e+00 : f32
    %250 = vector.broadcast %cst_158 : f32 to vector<5x128xf32>
    %251 = arith.addf %250, %249 : vector<5x128xf32>
    %cst_159 = arith.constant 5.000000e-01 : f32
    %252 = vector.broadcast %cst_159 : f32 to vector<5x128xf32>
    %253 = arith.mulf %252, %251 : vector<5x128xf32>
    %254 = arith.mulf %241, %253 : vector<5x128xf32>
    %c1_160 = arith.constant 1 : index
    %c0_161 = arith.constant 0 : index
    %c0_162 = arith.constant 0 : index
    %255 = vector.load %arg19[%c1_160, %c0_161, %c0_162] : memref<2x128x32xf32, #tpu.memory_space<vmem>>, vector<1x128x32xf32>
    %256 = vector.shape_cast %255 : vector<1x128x32xf32> to vector<128x32xf32>
    %cst_163 = arith.constant dense<0.000000e+00> : vector<5x32xf32>
    %257 = tpu.matmul %254, %256, %cst_163 {dimension_numbers = #tpu.dot_dimension_numbers<[1], [0], [0], [1], [0, 0, 1, 1], [], []>} : vector<5x128xf32>, vector<128x32xf32>, vector<5x32xf32> -> vector<5x32xf32>
    %c1_164 = arith.constant 1 : index
    %c0_165 = arith.constant 0 : index
    %c0_166 = arith.constant 0 : index
    %258 = vector.load %arg20[%c1_164, %c0_165, %c0_166] : memref<2x1x32xf32, #tpu.memory_space<vmem>>, vector<1x1x32xf32>
    %259 = vector.shape_cast %258 : vector<1x1x32xf32> to vector<1x32xf32>
    %260 = vector.broadcast %259 : vector<1x32xf32> to vector<5x32xf32>
    %261 = arith.addf %257, %260 : vector<5x32xf32>
    %262 = arith.addf %210, %261 : vector<5x32xf32>
    %c0_167 = arith.constant 0 : index
    %c0_168 = arith.constant 0 : index
    %263 = vector.load %arg21[%c0_167, %c0_168] : memref<1x32xf32, #tpu.memory_space<vmem>>, vector<1x32xf32>
    %c0_169 = arith.constant 0 : index
    %c0_170 = arith.constant 0 : index
    %264 = vector.load %arg22[%c0_169, %c0_170] : memref<1x32xf32, #tpu.memory_space<vmem>>, vector<1x32xf32>
    %cst_171 = arith.constant dense<0.000000e+00> : vector<5xf32>
    %265 = vector.multi_reduction <add>, %262, %cst_171 [1] : vector<5x32xf32> to vector<5xf32>
    %266 = vector.shape_cast %265 : vector<5xf32> to vector<5x1xf32>
    %cst_172 = arith.constant 3.200000e+01 : f32
    %267 = vector.broadcast %cst_172 : f32 to vector<5x1xf32>
    %268 = arith.divf %266, %267 : vector<5x1xf32>
    %269 = vector.broadcast %268 : vector<5x1xf32> to vector<5x32xf32>
    %270 = arith.subf %262, %269 : vector<5x32xf32>
    %271 = arith.mulf %270, %270 : vector<5x32xf32>
    %cst_173 = arith.constant dense<0.000000e+00> : vector<5xf32>
    %272 = vector.multi_reduction <add>, %271, %cst_173 [1] : vector<5x32xf32> to vector<5xf32>
    %273 = vector.shape_cast %272 : vector<5xf32> to vector<5x1xf32>
    %cst_174 = arith.constant 3.200000e+01 : f32
    %274 = vector.broadcast %cst_174 : f32 to vector<5x1xf32>
    %275 = arith.divf %273, %274 : vector<5x1xf32>
    %cst_175 = arith.constant 9.99999996E-13 : f32
    %276 = vector.broadcast %cst_175 : f32 to vector<5x1xf32>
    %277 = arith.addf %275, %276 : vector<5x1xf32>
    %278 = math.rsqrt %277 : vector<5x1xf32>
    %279 = vector.broadcast %278 : vector<5x1xf32> to vector<5x32xf32>
    %280 = arith.mulf %270, %279 : vector<5x32xf32>
    %281 = vector.broadcast %263 : vector<1x32xf32> to vector<5x32xf32>
    %282 = arith.mulf %280, %281 : vector<5x32xf32>
    %283 = vector.broadcast %264 : vector<1x32xf32> to vector<5x32xf32>
    %284 = arith.addf %282, %283 : vector<5x32xf32>
    %c0_176 = arith.constant 0 : index
    %c0_177 = arith.constant 0 : index
    %c0_178 = arith.constant 0 : index
    %285 = vector.load %arg23[%c0_176, %c0_177, %c0_178] : memref<1x5x32xf32, #tpu.memory_space<vmem>>, vector<1x5x32xf32>
    %286 = vector.shape_cast %285 : vector<1x5x32xf32> to vector<5x32xf32>
    %287 = vector.shape_cast %284 : vector<5x32xf32> to vector<1x5x32xf32>
    tpu.vector_store %arg23[%c0_176, %c0_177, %c0_178], %287 {strides = array<i32>} : memref<1x5x32xf32, #tpu.memory_space<vmem>>, vector<1x5x32xf32>,
    return
  }
  func.func @transform_0(%arg0: i32) -> (i32, i32, i32) {
    %c0_i32 = arith.constant 0 : i32
    %c0_i32_0 = arith.constant 0 : i32
    %c0_i32_1 = arith.constant 0 : i32
    return %arg0, %c0_i32, %c0_i32_0 : i32, i32, i32
  }
  func.func @transform_1(%arg0: i32) -> (i32, i32) {
    %c0_i32 = arith.constant 0 : i32
    %c0_i32_0 = arith.constant 0 : i32
    %c0_i32_1 = arith.constant 0 : i32
    return %c0_i32, %c0_i32_0 : i32, i32
  }
  func.func @transform_2(%arg0: i32) -> (i32, i32) {
    %c0_i32 = arith.constant 0 : i32
    %c0_i32_0 = arith.constant 0 : i32
    %c0_i32_1 = arith.constant 0 : i32
    return %c0_i32, %c0_i32_0 : i32, i32
  }
  func.func @transform_3(%arg0: i32) -> (i32, i32) {
    %c0_i32 = arith.constant 0 : i32
    %c0_i32_0 = arith.constant 0 : i32
    %c0_i32_1 = arith.constant 0 : i32
    return %c0_i32, %c0_i32_0 : i32, i32
  }
  func.func @transform_4(%arg0: i32) -> (i32, i32, i32) {
    %c0_i32 = arith.constant 0 : i32
    %c0_i32_0 = arith.constant 0 : i32
    %c0_i32_1 = arith.constant 0 : i32
    %c0_i32_2 = arith.constant 0 : i32
    return %c0_i32, %c0_i32_0, %c0_i32_1 : i32, i32, i32
  }
  func.func @transform_5(%arg0: i32) -> (i32, i32, i32) {
    %c0_i32 = arith.constant 0 : i32
    %c0_i32_0 = arith.constant 0 : i32
    %c0_i32_1 = arith.constant 0 : i32
    %c0_i32_2 = arith.constant 0 : i32
    return %c0_i32, %c0_i32_0, %c0_i32_1 : i32, i32, i32
  }
  func.func @transform_6(%arg0: i32) -> (i32, i32, i32, i32) {
    %c0_i32 = arith.constant 0 : i32
    %c0_i32_0 = arith.constant 0 : i32
    %c0_i32_1 = arith.constant 0 : i32
    %c0_i32_2 = arith.constant 0 : i32
    %c0_i32_3 = arith.constant 0 : i32
    return %c0_i32, %c0_i32_0, %c0_i32_1, %c0_i32_2 : i32, i32, i32, i32
  }
  func.func @transform_7(%arg0: i32) -> (i32, i32, i32, i32) {
    %c0_i32 = arith.constant 0 : i32
    %c0_i32_0 = arith.constant 0 : i32
    %c0_i32_1 = arith.constant 0 : i32
    %c0_i32_2 = arith.constant 0 : i32
    %c0_i32_3 = arith.constant 0 : i32
    return %c0_i32, %c0_i32_0, %c0_i32_1, %c0_i32_2 : i32, i32, i32, i32
  }
  func.func @transform_8(%arg0: i32) -> (i32, i32, i32, i32) {
    %c0_i32 = arith.constant 0 : i32
    %c0_i32_0 = arith.constant 0 : i32
    %c0_i32_1 = arith.constant 0 : i32
    %c0_i32_2 = arith.constant 0 : i32
    %c0_i32_3 = arith.constant 0 : i32
    return %c0_i32, %c0_i32_0, %c0_i32_1, %c0_i32_2 : i32, i32, i32, i32
  }
  func.func @transform_9(%arg0: i32) -> (i32, i32, i32, i32) {
    %c0_i32 = arith.constant 0 : i32
    %c0_i32_0 = arith.constant 0 : i32
    %c0_i32_1 = arith.constant 0 : i32
    %c0_i32_2 = arith.constant 0 : i32
    %c0_i32_3 = arith.constant 0 : i32
    return %c0_i32, %c0_i32_0, %c0_i32_1, %c0_i32_2 : i32, i32, i32, i32
  }
  func.func @transform_10(%arg0: i32) -> (i32, i32, i32, i32) {
    %c0_i32 = arith.constant 0 : i32
    %c0_i32_0 = arith.constant 0 : i32
    %c0_i32_1 = arith.constant 0 : i32
    %c0_i32_2 = arith.constant 0 : i32
    %c0_i32_3 = arith.constant 0 : i32
    return %c0_i32, %c0_i32_0, %c0_i32_1, %c0_i32_2 : i32, i32, i32, i32
  }
  func.func @transform_11(%arg0: i32) -> (i32, i32, i32, i32) {
    %c0_i32 = arith.constant 0 : i32
    %c0_i32_0 = arith.constant 0 : i32
    %c0_i32_1 = arith.constant 0 : i32
    %c0_i32_2 = arith.constant 0 : i32
    %c0_i32_3 = arith.constant 0 : i32
    return %c0_i32, %c0_i32_0, %c0_i32_1, %c0_i32_2 : i32, i32, i32, i32
  }
  func.func @transform_12(%arg0: i32) -> (i32, i32, i32, i32) {
    %c0_i32 = arith.constant 0 : i32
    %c0_i32_0 = arith.constant 0 : i32
    %c0_i32_1 = arith.constant 0 : i32
    %c0_i32_2 = arith.constant 0 : i32
    %c0_i32_3 = arith.constant 0 : i32
    return %c0_i32, %c0_i32_0, %c0_i32_1, %c0_i32_2 : i32, i32, i32, i32
  }
  func.func @transform_13(%arg0: i32) -> (i32, i32, i32) {
    %c0_i32 = arith.constant 0 : i32
    %c0_i32_0 = arith.constant 0 : i32
    %c0_i32_1 = arith.constant 0 : i32
    %c0_i32_2 = arith.constant 0 : i32
    return %c0_i32, %c0_i32_0, %c0_i32_1 : i32, i32, i32
  }
  func.func @transform_14(%arg0: i32) -> (i32, i32, i32) {
    %c0_i32 = arith.constant 0 : i32
    %c0_i32_0 = arith.constant 0 : i32
    %c0_i32_1 = arith.constant 0 : i32
    %c0_i32_2 = arith.constant 0 : i32
    return %c0_i32, %c0_i32_0, %c0_i32_1 : i32, i32, i32
  }
  func.func @transform_15(%arg0: i32) -> (i32, i32, i32) {
    %c0_i32 = arith.constant 0 : i32
    %c0_i32_0 = arith.constant 0 : i32
    %c0_i32_1 = arith.constant 0 : i32
    %c0_i32_2 = arith.constant 0 : i32
    return %c0_i32, %c0_i32_0, %c0_i32_1 : i32, i32, i32
  }
  func.func @transform_16(%arg0: i32) -> (i32, i32, i32) {
    %c0_i32 = arith.constant 0 : i32
    %c0_i32_0 = arith.constant 0 : i32
    %c0_i32_1 = arith.constant 0 : i32
    %c0_i32_2 = arith.constant 0 : i32
    return %c0_i32, %c0_i32_0, %c0_i32_1 : i32, i32, i32
  }
  func.func @transform_17(%arg0: i32) -> (i32, i32, i32) {
    %c0_i32 = arith.constant 0 : i32
    %c0_i32_0 = arith.constant 0 : i32
    %c0_i32_1 = arith.constant 0 : i32
    %c0_i32_2 = arith.constant 0 : i32
    return %c0_i32, %c0_i32_0, %c0_i32_1 : i32, i32, i32
  }
  func.func @transform_18(%arg0: i32) -> (i32, i32, i32) {
    %c0_i32 = arith.constant 0 : i32
    %c0_i32_0 = arith.constant 0 : i32
    %c0_i32_1 = arith.constant 0 : i32
    %c0_i32_2 = arith.constant 0 : i32
    return %c0_i32, %c0_i32_0, %c0_i32_1 : i32, i32, i32
  }
  func.func @transform_19(%arg0: i32) -> (i32, i32, i32) {
    %c0_i32 = arith.constant 0 : i32
    %c0_i32_0 = arith.constant 0 : i32
    %c0_i32_1 = arith.constant 0 : i32
    %c0_i32_2 = arith.constant 0 : i32
    return %c0_i32, %c0_i32_0, %c0_i32_1 : i32, i32, i32
  }
  func.func @transform_20(%arg0: i32) -> (i32, i32) {
    %c0_i32 = arith.constant 0 : i32
    %c0_i32_0 = arith.constant 0 : i32
    %c0_i32_1 = arith.constant 0 : i32
    return %c0_i32, %c0_i32_0 : i32, i32
  }
  func.func @transform_21(%arg0: i32) -> (i32, i32) {
    %c0_i32 = arith.constant 0 : i32
    %c0_i32_0 = arith.constant 0 : i32
    %c0_i32_1 = arith.constant 0 : i32
    return %c0_i32, %c0_i32_0 : i32, i32
  }
  func.func @transform_22(%arg0: i32) -> (i32, i32, i32) {
    %c0_i32 = arith.constant 0 : i32
    %c0_i32_0 = arith.constant 0 : i32
    %c0_i32_1 = arith.constant 0 : i32
    return %arg0, %c0_i32, %c0_i32_0 : i32, i32, i32
  }
}

</mosaic_0001>

<bundles_post_ra>
// kernel: model_without_head_forward.1
= control target key start
LH: loop header
LB: loop body
LE: loop exit
PB: predicated region body
PF: predicated region fallthrough
CT: control target
= control target key end

     0   :  { %s4920_s0 = inlined_call_operand.vmem [shape: f32[2,5,192], index: 0, kind: input, shape index: {}]   ;;  %s4921_s1 = inlined_call_operand.vmem [shape: f32[192,32], index: 1, kind: input, shape index: {}]   ;;  %s4922_s2 = inlined_call_operand.vmem [shape: f32[1,32], index: 2, kind: input, shape index: {}]   ;;  %s4923_s3 = inlined_call_operand.vmem [shape: f32[5,32], index: 3, kind: input, shape index: {}]   ;;  %s4924_s4 = inlined_call_operand.vmem [shape: f32[2,1,32], index: 4, kind: input, shape index: {}]   ;;  %s4925_s5 = inlined_call_operand.vmem [shape: f32[2,1,32], index: 5, kind: input, shape index: {}]   ;;  %s4926_s6 = inlined_call_operand.vmem [shape: f32[2,2,32,16], index: 6, kind: input, shape index: {}]   ;;  %s4927_s7 = inlined_call_operand.vmem [shape: f32[2,2,1,16], index: 7, kind: input, shape index: {}]   ;;  %s4928_s8 = inlined_call_operand.vmem [shape: f32[2,2,32,16], index: 8, kind: input, shape index: {}]   ;;  %s4929_s9 = inlined_call_operand.vmem [shape: f32[2,2,1,16], index: 9, kind: input, shape index: {}]   ;;  %s4930_s10 = inlined_call_operand.vmem [shape: f32[2,2,32,16], index: 10, kind: input, shape index: {}]   ;;  %s4931_s11 = inlined_call_operand.vmem [shape: f32[2,2,1,16], index: 11, kind: input, shape index: {}]   ;;  %s4932_s12 = inlined_call_operand.vmem [shape: f32[2,2,16,32], index: 12, kind: input, shape index: {}]   ;;  %s4933_s13 = inlined_call_operand.vmem [shape: f32[2,1,32], index: 13, kind: input, shape index: {}]   ;;  %s4934_s14 = inlined_call_operand.vmem [shape: f32[2,1,32], index: 14, kind: input, shape index: {}]   ;;  %s4935_s15 = inlined_call_operand.vmem [shape: f32[2,1,32], index: 15, kind: input, shape index: {}]   ;;  %s4936_s16 = inlined_call_operand.vmem [shape: f32[2,32,128], index: 16, kind: input, shape index: {}]   ;;  %s4937_s17 = inlined_call_operand.vmem [shape: f32[2,1,128], index: 17, kind: input, shape index: {}]   ;;  %s4938_s18 = inlined_call_operand.vmem [shape: f32[2,128,32], index: 18, kind: input, shape index: {}]   ;;  %s4939_s19 = inlined_call_operand.vmem [shape: f32[2,1,32], index: 19, kind: input, shape index: {}]   ;;  %s4940_s20 = inlined_call_operand.vmem [shape: f32[1,32], index: 20, kind: input, shape index: {}]   ;;  %s4941_s21 = inlined_call_operand.vmem [shape: f32[1,32], index: 21, kind: input, shape index: {}]   ;;  %s4942_s22 = inlined_call_operand.vmem [shape: f32[2,5,32], index: 22, kind: output, shape index: {}]  }
   0x1   :  { %4948 = sst [smem:[#allocation2_spill]] %s4920_s0 }
   0x2   :  { %4949 = sst [smem:[#allocation3_spill]] %s4921_s1 }
   0x3   :  { %4950 = sst [smem:[#allocation4_spill]] %s4922_s2 }
   0x4   :  { %4951 = sst [smem:[#allocation5_spill]] %s4923_s3  ;;  %s4248_s3 = smov 0  }
   0x5   :  { %4952 = sst [smem:[#allocation6_spill]] %s4924_s4 }
   0x6   :  { %4953 = sst [smem:[#allocation7_spill]] %s4925_s5 }
   0x7   :  { %4954 = sst [smem:[#allocation8_spill]] %s4926_s6 }
   0x8 LB: > { %s3341_s28 = sadd.s32 4294967295, %s4128_s3   ;;  %p3345_p0 = scmp.ge.s32.totalorder %s4128_s3, 1  ;;  %s4128_s3 = sphi %s4248_s3, %s32_s3  }
   0x9   : > { %p612_p1 = scmp.lt.s32.totalorder %s4128_s3, 3 }
   0xb   : > { %p613_p2 = pnand %p3345_p0, %p612_p1 }
   0xc   : > { %s4955_s4 = sld [smem:[#allocation3_spill]] (!%p613_p2)  ;;  %p673_p3 = scmp.lt.s32.totalorder (!%p613_p2), %s3341_s28, 1  ;;  %v4130_v3 = vmov (!%p613_p2), 0.0|0.0   ;;  %vm715_vm0 = vcmask (!%p613_p2), 523264   ;;  %vm793_vm1 = vcmask (!%p613_p2), 258048   ;;  %vm4131_vm2 = vmmov (!%p613_p2), 0  }
   0xd   : > { %616 = sbr.rel (%p613_p2) target bundleno = 5154 (0x1422), region = 108  ;;  %3901 = vmatprep.subr.bf16.mxu0 (!%p613_p2), %v4130_v3  ;;  %3943 = vmatprep.subr.bf16.mxu1 (!%p613_p2), %v4130_v3  ;;  %s4956_s23 = sld [smem:[#allocation2_spill]] (!%p613_p2)  ;;  %v4132_v63 = vmov (!%p613_p2), 0.0   ;;  %vm844_vm3 = vcmask (!%p613_p2), 261120   ;;  %vm1312_vm4 = vcmask (!%p613_p2), 130048   ;;  %vm1494_vm5 = vcmask (!%p613_p2), 1044480  }
   0xe   : > { %s4957_s2 = sld [smem:[#allocation4_spill]] (!%p613_p2)  ;;  %s4958_s30 = sld [smem:[#allocation5_spill]] (!%p613_p2)  ;;  %3628 = vmatprep.mubr.msk.f32.mxu1 (!%p613_p2), %vm4131_vm2, %v4132_v63  ;;  %vm1467_vm6 = vcmask (!%p613_p2), 36864   ;;  %vm1490_vm7 = vcmask (!%p613_p2), 39936  }
   0xf   : > { %s4961_s24 = sld [smem:[#allocation7_spill]] (!%p613_p2) }
  0x12   : > { %v684_v0 = vld [vmem:[%s4955_s4] sm:$0xff] (!%p613_p2)  ;;  %v685_v1 = vld [vmem:[%s4955_s4 + $0x8] sm:$0xff] (!%p613_p2)  ;;  %v686_v2 = vld [vmem:[%s4955_s4 + $0x10] sm:$0xff] (!%p613_p2) }
  0x13   : > { %v3902_v4 = vpack.c.bf16 (!%p613_p2), %v685_v1, %v684_v0  ;;  %v687_v5 = vld [vmem:[%s4955_s4 + $0x18] sm:$0xff] (!%p613_p2)  ;;  %v688_v7 = vld [vmem:[%s4955_s4 + $0x20] sm:$0xff] (!%p613_p2)  ;;  %v689_v8 = vld [vmem:[%s4955_s4 + $0x28] sm:$0xff] (!%p613_p2) }
  0x14   : > { %s4963_s28 = smov (!%p673_p3, %s3341_s28), 1  ;;  %v3905_v6 = vpack.c.bf16 %v687_v5, %v686_v2  ;;  %v3908_v9 = vpack.c.bf16 %v689_v8, %v688_v7  ;;  %v690_v10 = vld [vmem:[%s4955_s4 + $0x30] sm:$0xff]  ;;  %v691_v11 = vld [vmem:[%s4955_s4 + $0x38] sm:$0xff]  ;;  %v692_v14 = vld [vmem:[%s4955_s4 + $0x40] sm:$0xff] }
  0x15   : > { %3903 = vmatpush1.bf16.msra.mxu0 %v3902_v4  ;;  %s3476_s29 = sshll.u32 %s4963_s28, 4  ;;  %v3911_v13 = vpack.c.bf16 %v691_v11, %v690_v10  ;;  %v693_v15 = vld [vmem:[%s4955_s4 + $0x48] sm:$0xff]  ;;  %v694_v17 = vld [vmem:[%s4955_s4 + $0x50] sm:$0xff]  ;;  %v695_v18 = vld [vmem:[%s4955_s4 + $0x58] sm:$0xff]  ;;  %s3348_s25 = sshll.u32 %s4963_s28, 3 }
  0x16   : > { %3904 = vmatprep.subr.bf16.mxu0 %v4130_v3  ;;  %s4283_s1 = scalar_lea.vmem %s4956_s23, %s3476_s29  ;;  %v3914_v16 = vpack.c.bf16 %v693_v15, %v692_v14  ;;  %v3917_v19 = vpack.c.bf16 %v695_v18, %v694_v17  ;;  %v696_v20 = vld [vmem:[%s4955_s4 + $0x60] sm:$0xff]  ;;  %v697_v21 = vld [vmem:[%s4955_s4 + $0x68] sm:$0xff]  ;;  %v698_v23 = vld [vmem:[%s4955_s4 + $0x70] sm:$0xff]  ;;  %s4959_s23 = sld [smem:[#allocation8_spill]] }
  0x17   : > { %v683_v12 = vld [vmem:[%s4283_s1 + $0x8] sm:$0x1f]  ;;  %v3920_v22 = vpack.c.bf16 %v697_v21, %v696_v20  ;;  %v699_v24 = vld [vmem:[%s4955_s4 + $0x78] sm:$0xff]  ;;  %v700_v26 = vld [vmem:[%s4955_s4 + $0x80] sm:$0xff] }
  0x18   : > { %3350 = vmatprep.mubr.msk.f32.mxu0 %vm715_vm0, %v683_v12  ;;  %v3923_v25 = vpack.c.bf16 %v699_v24, %v698_v23  ;;  %v701_v27 = vld [vmem:[%s4955_s4 + $0x88] sm:$0xff]  ;;  %v702_v29 = vld [vmem:[%s4955_s4 + $0x90] sm:$0xff]  ;;  %v703_v30 = vld [vmem:[%s4955_s4 + $0x98] sm:$0xff] }
  0x19   : > { %3906 = vmatpush1.bf16.msra.mxu0 %v3905_v6  ;;  %v3926_v28 = vpack.c.bf16 %v701_v27, %v700_v26  ;;  %v3929_v31 = vpack.c.bf16 %v703_v30, %v702_v29  ;;  %v704_v32 = vld [vmem:[%s4955_s4 + $0xa0] sm:$0xff]  ;;  %v705_v33 = vld [vmem:[%s4955_s4 + $0xa8] sm:$0xff]  ;;  %v706_v35 = vld [vmem:[%s4955_s4 + $0xb0] sm:$0xff] }
  0x1a   : > { %3907 = vmatprep.subr.bf16.mxu0 %v4130_v3  ;;  %v3932_v34 = vpack.c.bf16 %v705_v33, %v704_v32  ;;  %v707_v36 = vld [vmem:[%s4955_s4 + $0xb8] sm:$0xff]  ;;  %v682_v38 = vld [vmem:[%s4283_s1] sm:$0x1f]  ;;  %v989_v8 = vld [vmem:[%s4928_s8 + $0x8] sm:$0xff]  ;;  %s681_s1 = scalar_lea.vmem %s4942_s22, %s3348_s25 }
  0x1b   : > { %v3935_v37 = vpack.c.bf16 %v707_v36, %v706_v35  ;;  %v3349_v39 = vld [vmem:[%s4957_s2] ss:$0 sm:$0xff]  ;;  %s4960_s2 = sld [smem:[#allocation6_spill]]  ;;  %v991_v14 = vld [vmem:[%s4928_s8 + $0x18] sm:$0xff]  ;;  %v993_v17 = vld [vmem:[%s4928_s8 + $0x28] sm:$0xff] }
  0x1c   : > { %v789_v41 = vld [vmem:[%s4958_s30] sm:$0x1f]  ;;  %v827_v52 = vld [vmem:[%s4959_s23 + $0x28] sm:$0xff]  ;;  %v828_v57 = vld [vmem:[%s4959_s23 + $0x30] sm:$0xff] }
  0x1d   : > { %3909 = vmatpush1.bf16.msra.mxu0 %v3908_v9  ;;  %v826_v51 = vld [vmem:[%s4959_s23 + $0x20] sm:$0xff]  ;;  %v823_v55 = vld [vmem:[%s4959_s23 + $0x8] sm:$0xff]  ;;  %v829_v58 = vld [vmem:[%s4959_s23 + $0x38] sm:$0xff] }
  0x1e   : > { %3910 = vmatprep.subr.bf16.mxu0 %v4130_v3  ;;  %v3944_v53 = vpack.c.bf16 %v827_v52, %v826_v51  ;;  %v822_v54 = vld [vmem:[%s4959_s23] sm:$0xff]  ;;  %v3947_v59 = vpack.c.bf16 %v829_v58, %v828_v57  ;;  %v824_v60 = vld [vmem:[%s4959_s23 + $0x10] sm:$0xff]  ;;  %v825_v61 = vld [vmem:[%s4959_s23 + $0x18] sm:$0xff] }
  0x1f   : > { %v3938_v56 = vpack.c.bf16 %v823_v55, %v822_v54  ;;  %v3941_v62 = vpack.c.bf16 %v825_v61, %v824_v60  ;;  %v988_v7 = vld [vmem:[%s4928_s8] sm:$0xff]  ;;  %v995_v20 = vld [vmem:[%s4928_s8 + $0x38] sm:$0xff]  ;;  %v1151_v23 = vld [vmem:[%s4930_s10 + $0x8] sm:$0xff] }
  0x20   : > { %3945 = vmatpush3.bf16.msra.mxu1 %v3944_v53  ;;  %v3352_v9 = vld [vmem:[%s4961_s24] ss:$0 sm:$0xff]  ;;  %v3950_v11 = vpack.c.bf16 %v989_v8, %v988_v7  ;;  %v1153_v26 = vld [vmem:[%s4930_s10 + $0x18] sm:$0xff]  ;;  %v1155_v29 = vld [vmem:[%s4930_s10 + $0x28] sm:$0xff] }
  0x21   : > { %3912 = vmatpush1.bf16.msra.mxu0 %v3911_v13  ;;  %3946 = vmatprep.subr.bf16.mxu1 %v4130_v3  ;;  %v3351_v5 = vld [vmem:[%s4960_s2] ss:$0 sm:$0xff]  ;;  %v990_v13 = vld [vmem:[%s4928_s8 + $0x10] sm:$0xff]  ;;  %v1157_v32 = vld [vmem:[%s4930_s10 + $0x38] sm:$0xff] }
  0x22   : > { %3913 = vmatprep.subr.bf16.mxu0 %v4130_v3  ;;  %v3953_v15 = vpack.c.bf16 %v991_v14, %v990_v13  ;;  %v3361_v51 = vld [vmem:[%s4931_s11] ss:$0 sm:$0xff]  ;;  %v3362_v55 = vld [vmem:[%s4931_s11 + $0x1] ss:$0 sm:$0xff] }
  0x24   : > { %3948 = vmatpush3.bf16.msra.mxu1 %v3947_v59 }
  0x25   : > { %3915 = vmatpush1.bf16.msra.mxu0 %v3914_v16  ;;  %3949 = vmatprep.subr.bf16.mxu1 %v4130_v3  ;;  %v992_v16 = vld [vmem:[%s4928_s8 + $0x20] sm:$0xff] }
  0x26   : > { %3916 = vmatprep.subr.bf16.mxu0 %v4130_v3  ;;  %v3956_v18 = vpack.c.bf16 %v993_v17, %v992_v16  ;;  %v1644_v17 = vld [vmem:[%s4932_s12] sm:$0xff] }
  0x29   : > { %3918 = vmatpush1.bf16.msra.mxu0 %v3917_v19  ;;  %v994_v19 = vld [vmem:[%s4928_s8 + $0x30] sm:$0xff] }
  0x2a   : > { %3919 = vmatprep.subr.bf16.mxu0 %v4130_v3  ;;  %v3959_v21 = vpack.c.bf16 %v995_v20, %v994_v19 }
  0x2d   : > { %3921 = vmatpush1.bf16.msra.mxu0 %v3920_v22  ;;  %v1150_v22 = vld [vmem:[%s4930_s10] sm:$0xff] }
  0x2e   : > { %3922 = vmatprep.subr.bf16.mxu0 %v4130_v3  ;;  %v3962_v24 = vpack.c.bf16 %v1151_v23, %v1150_v22 }
  0x31   : > { %3924 = vmatpush1.bf16.msra.mxu0 %v3923_v25  ;;  %v1152_v25 = vld [vmem:[%s4930_s10 + $0x10] sm:$0xff] }
  0x32   : > { %3925 = vmatprep.subr.bf16.mxu0 %v4130_v3  ;;  %v3965_v27 = vpack.c.bf16 %v1153_v26, %v1152_v25  ;;  %v1647_v25 = vld [vmem:[%s4932_s12 + $0x18] sm:$0xff] }
  0x35   : > { %3927 = vmatpush1.bf16.msra.mxu0 %v3926_v28  ;;  %v1154_v28 = vld [vmem:[%s4930_s10 + $0x20] sm:$0xff] }
  0x36   : > { %3928 = vmatprep.subr.bf16.mxu0 %v4130_v3  ;;  %v3968_v30 = vpack.c.bf16 %v1155_v29, %v1154_v28 }
  0x39   : > { %3930 = vmatpush1.bf16.msra.mxu0 %v3929_v31  ;;  %v1156_v31 = vld [vmem:[%s4930_s10 + $0x30] sm:$0xff] }
  0x3a   : > { %3931 = vmatprep.subr.bf16.mxu0 %v4130_v3  ;;  %v3971_v33 = vpack.c.bf16 %v1157_v32, %v1156_v31 }
  0x3d   : > { %3933 = vmatpush1.bf16.msra.mxu0 %v3932_v34 }
  0x3e   : > { %3934 = vmatprep.subr.bf16.mxu0 %v4130_v3 }
  0x41   : > { %3936 = vmatpush1.bf16.msra.mxu0 %v3935_v37 }
  0x42   : > { %3937 = vmatprep.subr.bf16.mxu0 %v4130_v3 }
  0x44   : > { %784 = vmatmul.mubr.f32.vlgmr.msra.gmra.mrb[0].mxu0 %v682_v38  ;;  %v3357_v38 = vld [vmem:[%s4929_s9] ss:$0 sm:$0xff] }
  0x45   : > { %3939 = vmatpush3.bf16.msra.mxu0 %v3938_v56  ;;  %3617 = vmatprep.mubr.msk.f32.mxu0 %vm4131_vm2, %v4132_v63 }
  0x46   : > { %3940 = vmatprep.subr.bf16.mxu0 %v4130_v3 }
  0x49   : > { %3942 = vmatpush3.bf16.msra.mxu0 %v3941_v62 }
  0x4a   : > { %3675 = vmatprep.subr.mxu0 %v4132_v63 }
 0x117   : > { %v785_v40 = vpop.f32.mrb[0].mxu0 }
 0x118   : > { %v786_v42 = vadd.f32 %v3349_v39, %v785_v40  ;;  %v787_v43 = vpop.f32.mrb[1].mxu0  ;;  %v3353_v40 = vld [vmem:[%s4927_s7] ss:$0 sm:$0xff] }
 0x11a   : > { %v4358_v44 = vadd.f32 %v789_v41, %v786_v42 }
 0x11c   : > { %v794_v45 = vsel %vm793_vm1, %v4358_v44, 0.0 }
 0x11d   : > { %795 = vadd.xlane.f32.xlu0 %v794_v45  ;;  %v3358_v45 = vld [vmem:[%s4929_s9 + $0x1] ss:$0 sm:$0xff] }
 0x1aa   : > { %v796_v46 = vpop.xlane.xlu0 %795 }
 0x1ab   : > { %v798_v47 = vmul.f32 0.03125, %v796_v46 }
 0x1ad   : > { %v799_v48 = vsub.f32 %v4358_v44, %v798_v47  ;;  %v3354_v47 = vld [vmem:[%s4927_s7 + $0x1] ss:$0 sm:$0xff] }
 0x1af   : > { %v800_v49 = vmul.f32 %v799_v48, %v799_v48 }
 0x1b1   : > { %v801_v50 = vsel %vm793_vm1, %v800_v49, 0.0 }
 0x1b2   : > { %802 = vadd.xlane.f32.xlu0 %v801_v50 }
 0x23f   : > { %v803_v0 = vpop.xlane.xlu0 %802 }
 0x240   : > { %v804_v1 = vmul.f32 0.03125, %v803_v0 }
 0x242   : > { %v805_v2 = vadd.f32 1e-12, %v804_v1 }
 0x244   : > { %4092 = vrsqrt.f32 %v805_v2 }
 0x24e   : > { %v4093_v4 = vpop.eup %4092 }
 0x24f   : > { %v807_v6 = vmul.f32 %v4093_v4, %v799_v48 }
 0x251   : > { %v814_v10 = vmul.f32 %v3351_v5, %v807_v6 }
 0x253   : > { %v821_v12 = vadd.f32 %v3352_v9, %v814_v10 }
 0x255   : > { %3618 = vmatmul.mubr.msk.f32.vlgmr.msra.gmra.mrb[2].mxu0 %vm844_vm3, %v821_v12  ;;  %3629 = vmatmul.mubr.msk.f32.vlgmr.msra.gmra.mrb[0].mxu1 %vm844_vm3, %v821_v12 }
 0x256   : > { %3951 = vmatpush3.bf16.msra.mxu1 %v3950_v11  ;;  %3639 = vmatprep.mubr.msk.f32.mxu1 %vm4131_vm2, %v4132_v63 }
 0x257   : > { %3952 = vmatprep.subr.bf16.mxu1 %v4130_v3  ;;  %3677 = vmatprep.mubr.msk.f32.mxu0 %vm4131_vm2, %v4132_v63 }
 0x25a   : > { %3954 = vmatpush3.bf16.msra.mxu1 %v3953_v15 }
 0x25b   : > { %3955 = vmatprep.subr.bf16.mxu1 %v4130_v3 }
 0x25d   : > { %3640 = vmatmul.mubr.msk.f32.vlgmr.msra.gmra.mrb[2].mxu1 %vm844_vm3, %v821_v12 }
 0x25e   : > { %3957 = vmatpush3.bf16.msra.mxu1 %v3956_v18  ;;  %3650 = vmatprep.mubr.msk.f32.mxu1 %vm4131_vm2, %v4132_v63  ;;  %v1645_v18 = vld [vmem:[%s4932_s12 + $0x8] sm:$0xff] }
 0x25f   : > { %3958 = vmatprep.subr.bf16.mxu1 %v4130_v3  ;;  %v3974_v20 = vpack.c.bf16 %v1645_v18, %v1644_v17  ;;  %v1939_v17 = vld [vmem:[%s4938_s18 + $0x68] sm:$0xff] }
 0x262   : > { %3960 = vmatpush3.bf16.msra.mxu1 %v3959_v21 }
 0x263   : > { %3961 = vmatprep.subr.bf16.mxu1 %v4130_v3 }
 0x265   : > { %3651 = vmatmul.mubr.msk.f32.vlgmr.msra.gmra.mrb[4].mxu1 %vm844_vm3, %v821_v12 }
 0x266   : > { %3963 = vmatpush3.bf16.msra.mxu1 %v3962_v24  ;;  %3661 = vmatprep.mubr.msk.f32.mxu1 %vm4131_vm2, %v4132_v63  ;;  %v1646_v24 = vld [vmem:[%s4932_s12 + $0x10] sm:$0xff] }
 0x267   : > { %3964 = vmatprep.subr.bf16.mxu1 %v4130_v3  ;;  %v3977_v26 = vpack.c.bf16 %v1647_v25, %v1646_v24 }
 0x26a   : > { %3966 = vmatpush3.bf16.msra.mxu1 %v3965_v27 }
 0x26b   : > { %3967 = vmatprep.subr.bf16.mxu1 %v4130_v3 }
 0x26d   : > { %3662 = vmatmul.mubr.msk.f32.vlgmr.msra.gmra.mrb[6].mxu1 %vm844_vm3, %v821_v12 }
 0x26e   : > { %3969 = vmatpush3.bf16.msra.mxu1 %v3968_v30  ;;  %3672 = vmatprep.mubr.msk.f32.mxu1 %vm4131_vm2, %v4132_v63 }
 0x26f   : > { %3970 = vmatprep.subr.bf16.mxu1 %v4130_v3 }
 0x272   : > { %3972 = vmatpush3.bf16.msra.mxu1 %v3971_v33 }
 0x273   : > { %3690 = vmatprep.subr.mxu1 %v4132_v63 }
 0x275   : > { %3673 = vmatmul.mubr.msk.f32.vlgmr.msra.gmra.mrb[8].mxu1 %vm844_vm3, %v821_v12 }
 0x276   : > { %3692 = vmatprep.mubr.msk.f32.mxu1 %vm4131_vm2, %v4132_v63 }
 0x328   : > { %v914_v34 = vpop.f32.mrb[2].mxu0  ;;  %v984_v35 = vpop.f32.mrb[0].mxu1 }
 0x329   : > { %v3619_v36 = vpop.f32.mrb[3].mxu0  ;;  %v3630_v37 = vpop.f32.mrb[1].mxu1  ;;  %v915_v43 = vadd.f32 %v3353_v40, %v914_v34  ;;  %v985_v50 = vadd.f32 %v3354_v47, %v984_v35 }
 0x32a   : > { %v3375_v36 = vld [vmem:[%s4933_s13] ss:$0 sm:$0xff] }
 0x330   : > { %v1076_v39 = vpop.f32.mrb[2].mxu1 }
 0x331   : > { %v1077_v41 = vadd.f32 %v3357_v38, %v1076_v39  ;;  %v3641_v42 = vpop.f32.mrb[3].mxu1 }
 0x333   : > { %3676 = vmatpush3.xpose.msk.msra.mxu0 %vm1312_vm4, %v1077_v41 }
 0x334   : > { %3680 = vmatprep.subr.mxu0 %v4132_v63 }
 0x336   : > { %3678 = vmatmul.mubr.msk.f32.vlgmr.msra.gmra.mrb[4].mxu0 %vm1312_vm4, %v915_v43 }
 0x337   : > { %3682 = vmatprep.mubr.msk.f32.mxu0 %vm4131_vm2, %v4132_v63 }
 0x338   : > { %v1146_v46 = vpop.f32.mrb[4].mxu1 }
 0x339   : > { %v1147_v48 = vadd.f32 %v3358_v45, %v1146_v46  ;;  %v3652_v49 = vpop.f32.mrb[5].mxu1  ;;  %v1833_v46 = vld [vmem:[%s4936_s16] sm:$0xff] }
 0x33a   : > { %v1836_v49 = vld [vmem:[%s4936_s16 + $0x18] sm:$0xff] }
 0x33b   : > { %3681 = vmatpush3.xpose.msk.msra.mxu0 %vm1312_vm4, %v1147_v48  ;;  %v1835_v48 = vld [vmem:[%s4936_s16 + $0x10] sm:$0xff] }
 0x33c   : > { %3685 = vmatprep.subr.mxu0 %v4132_v63 }
 0x33e   : > { %3683 = vmatmul.mubr.msk.f32.vlgmr.msra.gmra.mrb[6].mxu0 %vm1312_vm4, %v985_v50  ;;  %v3983_v50 = vpack.c.bf16 %v1836_v49, %v1835_v48  ;;  %v3413_v49 = vld [vmem:[%s4930_s10 + $0x40] sm:$0xff] }
 0x33f   : > { %3687 = vmatprep.mubr.msk.f32.mxu0 %vm4131_vm2, %v4132_v63 }
 0x340   : > { %v1238_v52 = vpop.f32.mrb[6].mxu1 }
 0x341   : > { %v1239_v53 = vadd.f32 %v3361_v51, %v1238_v52  ;;  %v3663_v54 = vpop.f32.mrb[7].mxu1  ;;  %v1926_v51 = vld [vmem:[%s4938_s18] sm:$0xff]  ;;  %v1927_v52 = vld [vmem:[%s4938_s18 + $0x8] sm:$0xff] }
 0x343   : > { %3686 = vmatpush3.msk.msra.mxu0 %vm1494_vm5, %v1239_v53  ;;  %v3986_v53 = vpack.c.bf16 %v1927_v52, %v1926_v51  ;;  %v3387_v52 = vld [vmem:[%s4959_s23 + $0x50] sm:$0xff] }
 0x344   : > { %3973 = vmatprep.subr.bf16.mxu0 %v4130_v3 }
 0x348   : > { %v1308_v56 = vpop.f32.mrb[8].mxu1 }
 0x349   : > { %v1309_v57 = vadd.f32 %v3362_v55, %v1308_v56  ;;  %v3674_v58 = vpop.f32.mrb[9].mxu1 }
 0x34a   : > { %v3376_v58 = vld [vmem:[%s4934_s14] ss:$0 sm:$0xff] }
 0x34b   : > { %3691 = vmatpush3.msk.msra.mxu1 %vm1494_vm5, %v1309_v57 }
 0x34c   : > { %3976 = vmatprep.subr.bf16.mxu1 %v4130_v3 }
 0x409   : > { %v1385_v59 = vpop.f32.mrb[4].mxu0 }
 0x40a   : > { %v1465_v60 = vmul.f32 0.25, %v1385_v59  ;;  %v3679_v61 = vpop.f32.mrb[5].mxu0 }
 0x40c   : > { %v1468_v62 = vsel %vm1467_vm6, %v1465_v60, -inf }
 0x40d   : > { %1469 = vmax.xlane.f32.xlu1 %v1468_v62 }
 0x411   : > { %v1461_v0 = vpop.f32.mrb[6].mxu0 }
 0x412   : > { %v1466_v1 = vmul.f32 0.25, %v1461_v0  ;;  %v3684_v2 = vpop.f32.mrb[7].mxu0  ;;  %v1928_v0 = vld [vmem:[%s4938_s18 + $0x10] sm:$0xff] }
 0x414   : > { %v1471_v4 = vsel %vm1467_vm6, %v1466_v1, -inf }
 0x415   : > { %1472 = vmax.xlane.f32.xlu1 %v1471_v4  ;;  %v1930_v4 = vld [vmem:[%s4938_s18 + $0x20] sm:$0xff] }
 0x49a   : > { %v1470_v5 = vpop.xlane.xlu1 %1469 }
 0x49b   : > { %v1474_v6 = vsub.f32 %v1465_v60, %v1470_v5  ;;  %v3377_v60 = vld [vmem:[%s4935_s15] ss:$0 sm:$0xff]  ;;  %v1931_v5 = vld [vmem:[%s4938_s18 + $0x28] sm:$0xff] }
 0x49d   : > { %v1476_v7 = vmul.f32 1.442695, %v1474_v6  ;;  %v3992_v6 = vpack.c.bf16 %v1931_v5, %v1930_v4  ;;  %v3384_v4 = vld [vmem:[%s4961_s24 + $0x1] ss:$0 sm:$0xff] }
 0x49f   : > { %4094 = vpow2.f32 %v1476_v7  ;;  %v1932_v7 = vld [vmem:[%s4938_s18 + $0x30] sm:$0xff] }
 0x4a2   : > { %v1473_v8 = vpop.xlane.xlu1 %1472 }
 0x4a3   : > { %v1475_v9 = vsub.f32 %v1466_v1, %v1473_v8  ;;  %v1929_v1 = vld [vmem:[%s4938_s18 + $0x18] sm:$0xff] }
 0x4a4   : > { %v3989_v2 = vpack.c.bf16 %v1929_v1, %v1928_v0  ;;  %v1933_v8 = vld [vmem:[%s4938_s18 + $0x38] sm:$0xff]  ;;  %v3389_v1 = vld [vmem:[%s4959_s23 + $0x60] sm:$0xff] }
 0x4a5   : > { %v1478_v10 = vmul.f32 1.442695, %v1475_v9  ;;  %v3995_v9 = vpack.c.bf16 %v1933_v8, %v1932_v7  ;;  %v3391_v8 = vld [vmem:[%s4959_s23 + $0x70] sm:$0xff] }
 0x4a7   : > { %4096 = vpow2.f32 %v1478_v10  ;;  %v1934_v10 = vld [vmem:[%s4938_s18 + $0x40] sm:$0xff] }
 0x4a9   : > { %v4095_v11 = vpop.eup %4094 }
 0x4aa   : > { %v1480_v12 = vsel %vm1467_vm6, %v4095_v11, 0.0 }
 0x4ab   : > { %1481 = vadd.xlane.f32.xlu0 %v1480_v12 }
 0x4b1   : > { %v4097_v13 = vpop.eup %4096 }
 0x4b2   : > { %v1483_v14 = vsel %vm1467_vm6, %v4097_v13, 0.0 }
 0x4b3   : > { %1484 = vadd.xlane.f32.xlu1 %v1483_v14  ;;  %v1937_v14 = vld [vmem:[%s4938_s18 + $0x58] sm:$0xff] }
 0x538   : > { %v1482_v15 = vpop.xlane.xlu0 %1481 }
 0x539   : > { %4098 = vrcp.f32 %v1482_v15 }
 0x540   : > { %v1485_v16 = vpop.xlane.xlu1 %1484 }
 0x541   : > { %4100 = vrcp.f32 %v1485_v16  ;;  %v1938_v16 = vld [vmem:[%s4938_s18 + $0x60] sm:$0xff] }
 0x542   : > { %v4004_v18 = vpack.c.bf16 %v1939_v17, %v1938_v16  ;;  %v3403_v17 = vld [vmem:[%s4928_s8 + $0x60] sm:$0xff] }
 0x543   : > { %v4099_v19 = vpop.eup %4098 }
 0x544   : > { %v1488_v21 = vmul.f32 %v4099_v19, %v4095_v11  ;;  %v1935_v11 = vld [vmem:[%s4938_s18 + $0x48] sm:$0xff]  ;;  %v1940_v19 = vld [vmem:[%s4938_s18 + $0x70] sm:$0xff] }
 0x545   : > { %v3998_v12 = vpack.c.bf16 %v1935_v11, %v1934_v10  ;;  %v3399_v11 = vld [vmem:[%s4928_s8 + $0x40] sm:$0xff] }
 0x546   : > { %3688 = vmatmul.mubr.msk.f32.vlgmr.msra.gmra.mrb[8].mxu0 %vm1490_vm7, %v1488_v21 }
 0x547   : > { %3975 = vmatpush3.bf16.msra.mxu0 %v3974_v20  ;;  %3699 = vmatprep.mubr.msk.f32.mxu0 %vm4131_vm2, %v4132_v63  ;;  %v1941_v20 = vld [vmem:[%s4938_s18 + $0x78] sm:$0xff] }
 0x548   : > { %3979 = vmatprep.subr.bf16.mxu0 %v4130_v3  ;;  %v4007_v21 = vpack.c.bf16 %v1941_v20, %v1940_v19  ;;  %v3405_v20 = vld [vmem:[%s4928_s8 + $0x70] sm:$0xff] }
 0x54b   : > { %v4101_v22 = vpop.eup %4100 }
 0x54c   : > { %v1489_v23 = vmul.f32 %v4101_v22, %v4097_v13  ;;  %v1936_v13 = vld [vmem:[%s4938_s18 + $0x50] sm:$0xff]  ;;  %v3378_v22 = vld [vmem:[%s4937_s17] ss:$0 sm:$0xff] }
 0x54d   : > { %v4001_v15 = vpack.c.bf16 %v1937_v14, %v1936_v13  ;;  %v3401_v14 = vld [vmem:[%s4928_s8 + $0x50] sm:$0xff] }
 0x54e   : > { %3693 = vmatmul.mubr.msk.f32.vlgmr.msra.gmra.mrb[10].mxu1 %vm1490_vm7, %v1489_v23 }
 0x54f   : > { %3706 = vmatprep.mubr.msk.f32.mxu1 %vm4131_vm2, %v4132_v63  ;;  %3978 = vmatpush3.bf16.msra.mxu1 %v3977_v26 }
 0x550   : > { %3985 = vmatprep.subr.bf16.mxu1 %v4130_v3 }
 0x619   : > { %v1564_v27 = vpop.f32.mrb[8].mxu0 }
 0x61a   : > { %v3689_v28 = vpop.f32.mrb[9].mxu0  ;;  %3700 = vmatmul.mubr.msk.f32.vlgmr.msra.gmra.mrb[10].mxu0 %vm1312_vm4, %v1564_v27 }
 0x61b   : > { %3717 = vmatprep.mubr.msk.f32.mxu0 %vm4131_vm2, %v4132_v63 }
 0x621   : > { %v1640_v29 = vpop.f32.mrb[10].mxu1 }
 0x622   : > { %v3694_v30 = vpop.f32.mrb[11].mxu1  ;;  %3707 = vmatmul.mubr.msk.f32.vlgmr.msra.gmra.mrb[12].mxu1 %vm1312_vm4, %v1640_v29 }
 0x623   : > { %3752 = vmatprep.mubr.msk.f32.mxu1 %vm4131_vm2, %v4132_v63  ;;  %3987 = vmatpush3.bf16.msra.mxu1 %v3986_v53  ;;  %v3388_v53 = vld [vmem:[%s4959_s23 + $0x58] sm:$0xff] }
 0x624   : > { %3988 = vmatprep.subr.bf16.mxu1 %v4130_v3 }
 0x627   : > { %3990 = vmatpush3.bf16.msra.mxu1 %v3989_v2  ;;  %v3390_v2 = vld [vmem:[%s4959_s23 + $0x68] sm:$0xff] }
 0x628   : > { %3991 = vmatprep.subr.bf16.mxu1 %v4130_v3 }
 0x62b   : > { %3993 = vmatpush3.bf16.msra.mxu1 %v3992_v6  ;;  %v4016_v6 = vpack.c.bf16 %v3390_v2, %v3389_v1 }
 0x62c   : > { %3994 = vmatprep.subr.bf16.mxu1 %v4130_v3 }
 0x62f   : > { %3996 = vmatpush3.bf16.msra.mxu1 %v3995_v9  ;;  %v3392_v9 = vld [vmem:[%s4959_s23 + $0x78] sm:$0xff] }
 0x630   : > { %3997 = vmatprep.subr.bf16.mxu1 %v4130_v3  ;;  %v4019_v10 = vpack.c.bf16 %v3392_v9, %v3391_v8 }
 0x633   : > { %3999 = vmatpush3.bf16.msra.mxu1 %v3998_v12  ;;  %v3400_v12 = vld [vmem:[%s4928_s8 + $0x48] sm:$0xff] }
 0x634   : > { %4000 = vmatprep.subr.bf16.mxu1 %v4130_v3  ;;  %v4022_v13 = vpack.c.bf16 %v3400_v12, %v3399_v11  ;;  %v3435_v12 = vld [vmem:[%s4932_s12 + $0x20] sm:$0xff] }
 0x637   : > { %4002 = vmatpush3.bf16.msra.mxu1 %v4001_v15  ;;  %v3402_v15 = vld [vmem:[%s4928_s8 + $0x58] sm:$0xff] }
 0x638   : > { %4003 = vmatprep.subr.bf16.mxu1 %v4130_v3  ;;  %v4025_v16 = vpack.c.bf16 %v3402_v15, %v3401_v14 }
 0x63b   : > { %4005 = vmatpush3.bf16.msra.mxu1 %v4004_v18  ;;  %v3404_v18 = vld [vmem:[%s4928_s8 + $0x68] sm:$0xff] }
 0x63c   : > { %4006 = vmatprep.subr.bf16.mxu1 %v4130_v3  ;;  %v4028_v19 = vpack.c.bf16 %v3404_v18, %v3403_v17 }
 0x63f   : > { %4008 = vmatpush3.bf16.msra.mxu1 %v4007_v21  ;;  %v3406_v21 = vld [vmem:[%s4928_s8 + $0x78] sm:$0xff] }
 0x640   : > { %4033 = vmatprep.subr.bf16.mxu1 %v4130_v3 }
 0x6ed   : > { %v1717_v31 = vpop.f32.mrb[10].mxu0 }
 0x6ee   : > { %v3701_v32 = vpop.f32.mrb[11].mxu0 }
 0x6f5   : > { %v1790_v33 = vpop.f32.mrb[12].mxu1 }
 0x6f6   : > { %v1794_v34 = vadd.f32 %v1790_v33, %v1717_v31  ;;  %v3708_v35 = vpop.f32.mrb[13].mxu1 }
 0x6f7   : > { %v3380_v35 = vld [vmem:[%s4939_s19] ss:$0 sm:$0xff] }
 0x6f8   : > { %v1795_v37 = vadd.f32 %v1794_v34, %v4358_v44  ;;  %v1834_v44 = vld [vmem:[%s4936_s16 + $0x8] sm:$0xff] }
 0x6f9   : > { %v3980_v47 = vpack.c.bf16 %v1834_v44, %v1833_v46 }
 0x6fa   : > { %v4542_v38 = vadd.f32 %v3375_v36, %v1795_v37 }
 0x6fb   : > { %3981 = vmatpush3.bf16.msra.mxu0 %v3980_v47  ;;  %v3385_v47 = vld [vmem:[%s4959_s23 + $0x40] sm:$0xff] }
 0x6fc   : > { %v1806_v39 = vsel %vm793_vm1, %v4542_v38, 0.0  ;;  %3982 = vmatprep.subr.bf16.mxu0 %v4130_v3 }
 0x6fd   : > { %1807 = vadd.xlane.f32.xlu0 %v1806_v39 }
 0x6ff   : > { %3984 = vmatpush3.bf16.msra.mxu0 %v3983_v50  ;;  %v3414_v50 = vld [vmem:[%s4930_s10 + $0x48] sm:$0xff] }
 0x700   : > { %4009 = vmatprep.subr.bf16.mxu0 %v4130_v3  ;;  %v4034_v51 = vpack.c.bf16 %v3414_v50, %v3413_v49  ;;  %v3424_v50 = vld [vmem:[%s4931_s11 + $0x3] ss:$0 sm:$0xff] }
 0x78a   : > { %v1808_v40 = vpop.xlane.xlu0 %1807 }
 0x78b   : > { %v1809_v41 = vmul.f32 0.03125, %v1808_v40 }
 0x78d   : > { %v1810_v42 = vsub.f32 %v4542_v38, %v1809_v41 }
 0x78f   : > { %v1811_v43 = vmul.f32 %v1810_v42, %v1810_v42 }
 0x791   : > { %v1812_v45 = vsel %vm793_vm1, %v1811_v43, 0.0 }
 0x792   : > { %1813 = vadd.xlane.f32.xlu1 %v1812_v45 }
 0x81f   : > { %v1814_v54 = vpop.xlane.xlu1 %1813 }
 0x820   : > { %v1815_v55 = vmul.f32 0.03125, %v1814_v54  ;;  %v4013_v54 = vpack.c.bf16 %v3388_v53, %v3387_v52 }
 0x822   : > { %v1816_v56 = vadd.f32 1e-12, %v1815_v55  ;;  %v3415_v55 = vld [vmem:[%s4930_s10 + $0x50] sm:$0xff] }
 0x824   : > { %4102 = vrsqrt.f32 %v1816_v56  ;;  %v3416_v56 = vld [vmem:[%s4930_s10 + $0x58] sm:$0xff] }
 0x82e   : > { %v4103_v57 = vpop.eup %4102 }
 0x82f   : > { %v1818_v59 = vmul.f32 %v4103_v57, %v1810_v42  ;;  %v4037_v57 = vpack.c.bf16 %v3416_v56, %v3415_v55 }
 0x831   : > { %v1825_v61 = vmul.f32 %v3376_v58, %v1818_v59 }
 0x833   : > { %v1832_v62 = vadd.f32 %v3377_v60, %v1825_v61 }
 0x835   : > { %3718 = vmatmul.mubr.msk.f32.vlgmr.msra.gmra.mrb[12].mxu0 %vm844_vm3, %v1832_v62  ;;  %v3383_v62 = vld [vmem:[%s4960_s2 + $0x1] ss:$0 sm:$0xff] }
 0x836   : > { %3763 = vmatprep.mubr.msk.f32.mxu0 %vm4131_vm2, %v4132_v63 }
 0x908   : > { %v1913_v23 = vpop.f32.mrb[12].mxu0 }
 0x909   : > { %v1914_v24 = vadd.f32 %v3378_v22, %v1913_v23  ;;  %v3719_v25 = vpop.f32.mrb[13].mxu0  ;;  %v4031_v22 = vpack.c.bf16 %v3406_v21, %v3405_v20  ;;  %v3417_v23 = vld [vmem:[%s4930_s10 + $0x60] sm:$0xff]  ;;  %v3438_v20 = vld [vmem:[%s4932_s12 + $0x38] sm:$0xff] }
 0x90b   : > { %v1917_v26 = vmul.f32 %v1914_v24, %v1914_v24 }
 0x90d   : > { %v1918_v27 = vmul.f32 %v1917_v26, %v1914_v24  ;;  %v3419_v26 = vld [vmem:[%s4930_s10 + $0x70] sm:$0xff] }
 0x90f   : > { %v1919_v28 = vmul.f32 0.044715, %v1918_v27  ;;  %v3420_v27 = vld [vmem:[%s4930_s10 + $0x78] sm:$0xff] }
 0x911   : > { %v1920_v29 = vadd.f32 %v1919_v28, %v1914_v24  ;;  %v4043_v28 = vpack.c.bf16 %v3420_v27, %v3419_v26 }
 0x913   : > { %v1921_v30 = vmul.f32 0.7978846, %v1920_v29  ;;  %v3423_v29 = vld [vmem:[%s4931_s11 + $0x2] ss:$0 sm:$0xff] }
 0x915   : > { %4104 = vtanh.f32 %v1921_v30 }
 0x91f   : > { %v4105_v31 = vpop.eup %4104 }
 0x920   : > { %v1923_v32 = vadd.f32 1.0, %v4105_v31 }
 0x922   : > { %v1924_v33 = vmul.f32 0.5, %v1923_v32 }
 0x924   : > { %v1925_v34 = vmul.f32 %v1924_v33, %v1914_v24  ;;  %v3418_v24 = vld [vmem:[%s4930_s10 + $0x68] sm:$0xff] }
 0x925   : > { %v4040_v25 = vpack.c.bf16 %v3418_v24, %v3417_v23 }
 0x926   : > { %3753 = vmatmul.mubr.f32.vlgmr.msra.gmra.mrb[14].mxu1 %v1925_v34 }
 0x927   : > { %3807 = vmatprep.mubr.msk.f32.mxu1 %vm4131_vm2, %v4132_v63  ;;  %4035 = vmatpush3.bf16.msra.mxu1 %v4034_v51 }
 0x928   : > { %4036 = vmatprep.subr.bf16.mxu1 %v4130_v3 }
 0x92b   : > { %4038 = vmatpush3.bf16.msra.mxu1 %v4037_v57 }
 0x92c   : > { %3821 = vmatprep.subr.mxu1 %v4132_v63 }
 0x9f9   : > { %v2015_v36 = vpop.f32.mrb[14].mxu1 }
 0x9fa   : > { %v2016_v37 = vadd.f32 %v3380_v35, %v2015_v36  ;;  %v3754_v39 = vpop.f32.mrb[15].mxu1 }
 0x9fc   : > { %v4636_v40 = vadd.f32 %v2016_v37, %v4542_v38  ;;  %v3386_v38 = vld [vmem:[%s4959_s23 + $0x48] sm:$0xff]  ;;  %v3409_v37 = vld [vmem:[%s4929_s9 + $0x2] ss:$0 sm:$0xff] }
 0x9fd   : > { %v4010_v48 = vpack.c.bf16 %v3386_v38, %v3385_v47  ;;  %v3396_v47 = vld [vmem:[%s4927_s7 + $0x3] ss:$0 sm:$0xff] }
 0x9fe   : > { %v2024_v41 = vsel %vm793_vm1, %v4636_v40, 0.0 }
 0x9ff   : > { %2025 = vadd.xlane.f32.xlu0 %v2024_v41  ;;  %4011 = vmatpush3.bf16.msra.mxu0 %v4010_v48  ;;  %v3395_v41 = vld [vmem:[%s4927_s7 + $0x2] ss:$0 sm:$0xff] }
 0xa00   : > { %4012 = vmatprep.subr.bf16.mxu0 %v4130_v3 }
 0xa03   : > { %4014 = vmatpush3.bf16.msra.mxu0 %v4013_v54 }
 0xa04   : > { %4015 = vmatprep.subr.bf16.mxu0 %v4130_v3 }
 0xa8c   : > { %v2026_v42 = vpop.xlane.xlu0 %2025 }
 0xa8d   : > { %v2027_v43 = vmul.f32 0.03125, %v2026_v42 }
 0xa8f   : > { %v2028_v45 = vsub.f32 %v4636_v40, %v2027_v43 }
 0xa91   : > { %v2029_v46 = vmul.f32 %v2028_v45, %v2028_v45 }
 0xa93   : > { %v2030_v44 = vsel %vm793_vm1, %v2029_v46, 0.0  ;;  %v3410_v46 = vld [vmem:[%s4929_s9 + $0x3] ss:$0 sm:$0xff] }
 0xa94   : > { %2031 = vadd.xlane.f32.xlu1 %v2030_v44 }
 0xb21   : > { %v2032_v58 = vpop.xlane.xlu1 %2031 }
 0xb22   : > { %v2033_v59 = vmul.f32 0.03125, %v2032_v58 }
 0xb24   : > { %v2034_v60 = vadd.f32 1e-12, %v2033_v59 }
 0xb26   : > { %4106 = vrsqrt.f32 %v2034_v60 }
 0xb30   : > { %v4107_v61 = vpop.eup %4106 }
 0xb31   : > { %v2036_v0 = vmul.f32 %v4107_v61, %v2028_v45 }
 0xb33   : > { %v2043_v5 = vmul.f32 %v3383_v62, %v2036_v0 }
 0xb35   : > { %v2050_v7 = vadd.f32 %v3384_v4, %v2043_v5 }
 0xb37   : > { %3764 = vmatmul.mubr.msk.f32.vlgmr.msra.gmra.mrb[14].mxu0 %vm844_vm3, %v2050_v7  ;;  %3808 = vmatmul.mubr.msk.f32.vlgmr.msra.gmra.mrb[16].mxu1 %vm844_vm3, %v2050_v7 }
 0xb38   : > { %4017 = vmatpush3.bf16.msra.mxu0 %v4016_v6  ;;  %3774 = vmatprep.mubr.msk.f32.mxu0 %vm4131_vm2, %v4132_v63 }
 0xb39   : > { %4018 = vmatprep.subr.bf16.mxu0 %v4130_v3  ;;  %3823 = vmatprep.mubr.msk.f32.mxu1 %vm4131_vm2, %v4132_v63 }
 0xb3c   : > { %4020 = vmatpush3.bf16.msra.mxu0 %v4019_v10 }
 0xb3d   : > { %4021 = vmatprep.subr.bf16.mxu0 %v4130_v3 }
 0xb3f   : > { %3775 = vmatmul.mubr.msk.f32.vlgmr.msra.gmra.mrb[16].mxu0 %vm844_vm3, %v2050_v7 }
 0xb40   : > { %4023 = vmatpush3.bf16.msra.mxu0 %v4022_v13  ;;  %3785 = vmatprep.mubr.msk.f32.mxu0 %vm4131_vm2, %v4132_v63  ;;  %v3436_v13 = vld [vmem:[%s4932_s12 + $0x28] sm:$0xff] }
 0xb41   : > { %4024 = vmatprep.subr.bf16.mxu0 %v4130_v3  ;;  %v4046_v15 = vpack.c.bf16 %v3436_v13, %v3435_v12  ;;  %v3468_v13 = vld [vmem:[%s4938_s18 + $0xf0] sm:$0xff] }
 0xb44   : > { %4026 = vmatpush3.bf16.msra.mxu0 %v4025_v16 }
 0xb45   : > { %4027 = vmatprep.subr.bf16.mxu0 %v4130_v3 }
 0xb47   : > { %3786 = vmatmul.mubr.msk.f32.vlgmr.msra.gmra.mrb[18].mxu0 %vm844_vm3, %v2050_v7 }
 0xb48   : > { %4029 = vmatpush3.bf16.msra.mxu0 %v4028_v19  ;;  %3796 = vmatprep.mubr.msk.f32.mxu0 %vm4131_vm2, %v4132_v63  ;;  %v3437_v19 = vld [vmem:[%s4932_s12 + $0x30] sm:$0xff] }
 0xb49   : > { %4030 = vmatprep.subr.bf16.mxu0 %v4130_v3  ;;  %v4049_v21 = vpack.c.bf16 %v3438_v20, %v3437_v19 }
 0xb4c   : > { %4032 = vmatpush3.bf16.msra.mxu0 %v4031_v22 }
 0xb4d   : > { %4039 = vmatprep.subr.bf16.mxu0 %v4130_v3 }
 0xb4f   : > { %3797 = vmatmul.mubr.msk.f32.vlgmr.msra.gmra.mrb[20].mxu0 %vm844_vm3, %v2050_v7 }
 0xb50   : > { %4041 = vmatpush3.bf16.msra.mxu0 %v4040_v25  ;;  %3818 = vmatprep.mubr.msk.f32.mxu0 %vm4131_vm2, %v4132_v63 }
 0xb51   : > { %4042 = vmatprep.subr.bf16.mxu0 %v4130_v3 }
 0xb54   : > { %4044 = vmatpush3.bf16.msra.mxu0 %v4043_v28 }
 0xb55   : > { %3831 = vmatprep.subr.mxu0 %v4132_v63 }
 0xb57   : > { %3819 = vmatmul.mubr.msk.f32.vlgmr.msra.gmra.mrb[22].mxu0 %vm844_vm3, %v2050_v7 }
 0xb58   : > { %3833 = vmatprep.mubr.msk.f32.mxu0 %vm4131_vm2, %v4132_v63 }
 0xc0a   : > { %v2144_v30 = vpop.f32.mrb[14].mxu0  ;;  %v2472_v31 = vpop.f32.mrb[16].mxu1 }
 0xc0b   : > { %v2473_v32 = vadd.f32 %v3423_v29, %v2472_v31  ;;  %v3765_v33 = vpop.f32.mrb[15].mxu0  ;;  %v3809_v34 = vpop.f32.mrb[17].mxu1  ;;  %v2145_v45 = vadd.f32 %v3395_v41, %v2144_v30  ;;  %v3442_v31 = vld [vmem:[%s4933_s13 + $0x1] ss:$0 sm:$0xff] }
 0xc0c   : > { %v3447_v41 = vld [vmem:[%s4936_s16 + $0x20] sm:$0xff] }
 0xc0d   : > { %3832 = vmatpush3.msk.msra.mxu0 %vm1494_vm5, %v2473_v32 }
 0xc0e   : > { %4045 = vmatprep.subr.bf16.mxu0 %v4130_v3 }
 0xc12   : > { %v2214_v35 = vpop.f32.mrb[16].mxu0 }
 0xc13   : > { %v3776_v36 = vpop.f32.mrb[17].mxu0  ;;  %v2215_v49 = vadd.f32 %v3396_v47, %v2214_v35  ;;  %v3455_v47 = vld [vmem:[%s4938_s18 + $0x88] sm:$0xff] }
 0xc1a   : > { %v2308_v39 = vpop.f32.mrb[18].mxu0 }
 0xc1b   : > { %v2309_v42 = vadd.f32 %v3409_v37, %v2308_v39  ;;  %v3787_v43 = vpop.f32.mrb[19].mxu0 }
 0xc1c   : > { %v3449_v43 = vld [vmem:[%s4936_s16 + $0x30] sm:$0xff] }
 0xc1d   : > { %3822 = vmatpush3.xpose.msk.msra.mxu1 %vm1312_vm4, %v2309_v42 }
 0xc1e   : > { %3826 = vmatprep.subr.mxu1 %v4132_v63 }
 0xc20   : > { %3824 = vmatmul.mubr.msk.f32.vlgmr.msra.gmra.mrb[18].mxu1 %vm1312_vm4, %v2145_v45  ;;  %v3450_v45 = vld [vmem:[%s4936_s16 + $0x38] sm:$0xff] }
 0xc21   : > { %3828 = vmatprep.mubr.msk.f32.mxu1 %vm4131_vm2, %v4132_v63 }
 0xc22   : > { %v2378_v44 = vpop.f32.mrb[20].mxu0 }
 0xc23   : > { %v2379_v38 = vadd.f32 %v3410_v46, %v2378_v44  ;;  %v3798_v48 = vpop.f32.mrb[21].mxu0  ;;  %v4055_v46 = vpack.c.bf16 %v3450_v45, %v3449_v43  ;;  %v3454_v44 = vld [vmem:[%s4938_s18 + $0x80] sm:$0xff] }
 0xc24   : > { %v3472_v45 = vld [vmem:[%s4940_s20] ss:$0 sm:$0xff] }
 0xc25   : > { %3827 = vmatpush3.xpose.msk.msra.mxu1 %vm1312_vm4, %v2379_v38  ;;  %v4058_v38 = vpack.c.bf16 %v3455_v47, %v3454_v44 }
 0xc26   : > { %3836 = vmatprep.subr.mxu1 %v4132_v63 }
 0xc28   : > { %3829 = vmatmul.mubr.msk.f32.vlgmr.msra.gmra.mrb[20].mxu1 %vm1312_vm4, %v2215_v49 }
 0xc29   : > { %3838 = vmatprep.mubr.msk.f32.mxu1 %vm4131_vm2, %v4132_v63 }
 0xc2a   : > { %v2542_v51 = vpop.f32.mrb[22].mxu0 }
 0xc2b   : > { %v2543_v52 = vadd.f32 %v3424_v50, %v2542_v51  ;;  %v3820_v53 = vpop.f32.mrb[23].mxu0 }
 0xc2d   : > { %3837 = vmatpush3.msk.msra.mxu1 %vm1494_vm5, %v2543_v52  ;;  %v3445_v52 = vld [vmem:[%s4934_s14 + $0x1] ss:$0 sm:$0xff] }
 0xc2e   : > { %4048 = vmatprep.subr.bf16.mxu1 %v4130_v3 }
 0xcf3   : > { %v2618_v54 = vpop.f32.mrb[18].mxu1 }
 0xcf4   : > { %v2698_v55 = vmul.f32 0.25, %v2618_v54  ;;  %v3825_v56 = vpop.f32.mrb[19].mxu1  ;;  %v3446_v54 = vld [vmem:[%s4935_s15 + $0x1] ss:$0 sm:$0xff] }
 0xcf6   : > { %v2700_v57 = vsel %vm1467_vm6, %v2698_v55, -inf }
 0xcf7   : > { %2701 = vmax.xlane.f32.xlu0 %v2700_v57  ;;  %v3456_v57 = vld [vmem:[%s4938_s18 + $0x90] sm:$0xff] }
 0xcfb   : > { %v2694_v58 = vpop.f32.mrb[20].mxu1 }
 0xcfc   : > { %v2699_v59 = vmul.f32 0.25, %v2694_v58  ;;  %v3830_v60 = vpop.f32.mrb[21].mxu1  ;;  %v3457_v58 = vld [vmem:[%s4938_s18 + $0x98] sm:$0xff] }
 0xcfd   : > { %v3458_v60 = vld [vmem:[%s4938_s18 + $0xa0] sm:$0xff] }
 0xcfe   : > { %v2703_v61 = vsel %vm1467_vm6, %v2699_v59, -inf }
 0xcff   : > { %2704 = vmax.xlane.f32.xlu1 %v2703_v61  ;;  %v3459_v61 = vld [vmem:[%s4938_s18 + $0xa8] sm:$0xff] }
 0xd84   : > { %v2702_v62 = vpop.xlane.xlu0 %2701 }
 0xd85   : > { %v2706_v0 = vsub.f32 %v2698_v55, %v2702_v62  ;;  %v4064_v62 = vpack.c.bf16 %v3459_v61, %v3458_v60 }
 0xd87   : > { %v2708_v1 = vmul.f32 1.442695, %v2706_v0  ;;  %v3460_v0 = vld [vmem:[%s4938_s18 + $0xb0] sm:$0xff] }
 0xd89   : > { %4108 = vpow2.f32 %v2708_v1  ;;  %v3461_v1 = vld [vmem:[%s4938_s18 + $0xb8] sm:$0xff] }
 0xd8c   : > { %v2705_v2 = vpop.xlane.xlu1 %2704 }
 0xd8d   : > { %v2707_v4 = vsub.f32 %v2699_v59, %v2705_v2  ;;  %v4061_v59 = vpack.c.bf16 %v3457_v58, %v3456_v57  ;;  %v4067_v2 = vpack.c.bf16 %v3461_v1, %v3460_v0 }
 0xd8f   : > { %v2710_v5 = vmul.f32 1.442695, %v2707_v4  ;;  %v3462_v4 = vld [vmem:[%s4938_s18 + $0xc0] sm:$0xff] }
 0xd91   : > { %4110 = vpow2.f32 %v2710_v5  ;;  %v3463_v5 = vld [vmem:[%s4938_s18 + $0xc8] sm:$0xff] }
 0xd93   : > { %v4109_v6 = vpop.eup %4108 }
 0xd94   : > { %v2712_v7 = vsel %vm1467_vm6, %v4109_v6, 0.0 }
 0xd95   : > { %2713 = vadd.xlane.f32.xlu0 %v2712_v7  ;;  %v3464_v7 = vld [vmem:[%s4938_s18 + $0xd0] sm:$0xff] }
 0xd9b   : > { %v4111_v8 = vpop.eup %4110 }
 0xd9c   : > { %v2715_v9 = vsel %vm1467_vm6, %v4111_v8, 0.0 }
 0xd9d   : > { %2716 = vadd.xlane.f32.xlu1 %v2715_v9 }
 0xe22   : > { %v2714_v10 = vpop.xlane.xlu0 %2713 }
 0xe23   : > { %4112 = vrcp.f32 %v2714_v10  ;;  %v3466_v10 = vld [vmem:[%s4938_s18 + $0xe0] sm:$0xff] }
 0xe2a   : > { %v2717_v11 = vpop.xlane.xlu1 %2716 }
 0xe2b   : > { %4114 = vrcp.f32 %v2717_v11  ;;  %v3467_v11 = vld [vmem:[%s4938_s18 + $0xe8] sm:$0xff] }
 0xe2c   : > { %v4076_v12 = vpack.c.bf16 %v3467_v11, %v3466_v10 }
 0xe2d   : > { %v4113_v14 = vpop.eup %4112 }
 0xe2e   : > { %v2720_v16 = vmul.f32 %v4113_v14, %v4109_v6  ;;  %v4070_v6 = vpack.c.bf16 %v3463_v5, %v3462_v4  ;;  %v3469_v14 = vld [vmem:[%s4938_s18 + $0xf8] sm:$0xff] }
 0xe30   : > { %3834 = vmatmul.mubr.msk.f32.vlgmr.msra.gmra.mrb[24].mxu0 %vm1490_vm7, %v2720_v16  ;;  %v3452_v16 = vld [vmem:[%s4937_s17 + $0x1] ss:$0 sm:$0xff] }
 0xe31   : > { %4047 = vmatpush3.bf16.msra.mxu0 %v4046_v15  ;;  %3845 = vmatprep.mubr.msk.f32.mxu0 %vm4131_vm2, %v4132_v63  ;;  %v4079_v15 = vpack.c.bf16 %v3469_v14, %v3468_v13 }
 0xe32   : > { %4051 = vmatprep.subr.bf16.mxu0 %v4130_v3 }
 0xe35   : > { %v4115_v17 = vpop.eup %4114 }
 0xe36   : > { %v2721_v18 = vmul.f32 %v4115_v17, %v4111_v8  ;;  %v3465_v8 = vld [vmem:[%s4938_s18 + $0xd8] sm:$0xff] }
 0xe37   : > { %v4073_v9 = vpack.c.bf16 %v3465_v8, %v3464_v7 }
 0xe38   : > { %3839 = vmatmul.mubr.msk.f32.vlgmr.msra.gmra.mrb[22].mxu1 %vm1490_vm7, %v2721_v18 }
 0xe39   : > { %3852 = vmatprep.mubr.msk.f32.mxu1 %vm4131_vm2, %v4132_v63  ;;  %4050 = vmatpush3.bf16.msra.mxu1 %v4049_v21 }
 0xe3a   : > { %4057 = vmatprep.subr.bf16.mxu1 %v4130_v3 }
 0xf03   : > { %v2794_v22 = vpop.f32.mrb[24].mxu0 }
 0xf04   : > { %v3835_v23 = vpop.f32.mrb[25].mxu0  ;;  %3846 = vmatmul.mubr.msk.f32.vlgmr.msra.gmra.mrb[26].mxu0 %vm1312_vm4, %v2794_v22 }
 0xf05   : > { %3863 = vmatprep.mubr.msk.f32.mxu0 %vm4131_vm2, %v4132_v63 }
 0xf0b   : > { %v2870_v24 = vpop.f32.mrb[22].mxu1 }
 0xf0c   : > { %v3840_v25 = vpop.f32.mrb[23].mxu1  ;;  %3853 = vmatmul.mubr.msk.f32.vlgmr.msra.gmra.mrb[24].mxu1 %vm1312_vm4, %v2870_v24 }
 0xf0d   : > { %3898 = vmatprep.mubr.msk.f32.mxu1 %vm4131_vm2, %v4132_v63  ;;  %4059 = vmatpush3.bf16.msra.mxu1 %v4058_v38 }
 0xf0e   : > { %4060 = vmatprep.subr.bf16.mxu1 %v4130_v3 }
 0xf11   : > { %4062 = vmatpush3.bf16.msra.mxu1 %v4061_v59 }
 0xf12   : > { %4063 = vmatprep.subr.bf16.mxu1 %v4130_v3 }
 0xf15   : > { %4065 = vmatpush3.bf16.msra.mxu1 %v4064_v62 }
 0xf16   : > { %4066 = vmatprep.subr.bf16.mxu1 %v4130_v3 }
 0xf19   : > { %4068 = vmatpush3.bf16.msra.mxu1 %v4067_v2 }
 0xf1a   : > { %4069 = vmatprep.subr.bf16.mxu1 %v4130_v3 }
 0xf1d   : > { %4071 = vmatpush3.bf16.msra.mxu1 %v4070_v6 }
 0xf1e   : > { %4072 = vmatprep.subr.bf16.mxu1 %v4130_v3 }
 0xf21   : > { %4074 = vmatpush3.bf16.msra.mxu1 %v4073_v9 }
 0xf22   : > { %4075 = vmatprep.subr.bf16.mxu1 %v4130_v3 }
 0xf25   : > { %4077 = vmatpush3.bf16.msra.mxu1 %v4076_v12 }
 0xf26   : > { %4078 = vmatprep.subr.bf16.mxu1 %v4130_v3 }
 0xf29   : > { %4080 = vmatpush3.bf16.msra.mxu1 %v4079_v15 }
 0xfd7   : > { %v2948_v26 = vpop.f32.mrb[26].mxu0 }
 0xfd8   : > { %v3847_v27 = vpop.f32.mrb[27].mxu0 }
 0xfdf   : > { %v3021_v28 = vpop.f32.mrb[24].mxu1 }
 0xfe0   : > { %v3025_v29 = vadd.f32 %v3021_v28, %v2948_v26  ;;  %v3854_v30 = vpop.f32.mrb[25].mxu1 }
 0xfe2   : > { %v3026_v32 = vadd.f32 %v3025_v29, %v4636_v40  ;;  %v3448_v40 = vld [vmem:[%s4936_s16 + $0x28] sm:$0xff] }
 0xfe3   : > { %v4052_v42 = vpack.c.bf16 %v3448_v40, %v3447_v41 }
 0xfe4   : > { %v4816_v33 = vadd.f32 %v3442_v31, %v3026_v32 }
 0xfe5   : > { %4053 = vmatpush3.bf16.msra.mxu0 %v4052_v42 }
 0xfe6   : > { %v3040_v34 = vsel %vm793_vm1, %v4816_v33, 0.0  ;;  %4054 = vmatprep.subr.bf16.mxu0 %v4130_v3  ;;  %v3471_v3 = vld [vmem:[%s4939_s19 + $0x1] ss:$0 sm:$0xff] }
 0xfe7   : > { %3041 = vadd.xlane.f32.xlu0 %v3040_v34 }
 0xfe9   : > { %4056 = vmatpush3.bf16.msra.mxu0 %v4055_v46  ;;  %v3473_v46 = vld [vmem:[%s4941_s21] ss:$0 sm:$0xff] }
0x1074   : > { %v3042_v35 = vpop.xlane.xlu0 %3041 }
0x1075   : > { %v3043_v36 = vmul.f32 0.03125, %v3042_v35 }
0x1077   : > { %v3044_v63 = vsub.f32 %v4816_v33, %v3043_v36 }
0x1079   : > { %v3045_v37 = vmul.f32 %v3044_v63, %v3044_v63 }
0x107b   : > { %v3046_v39 = vsel %vm793_vm1, %v3045_v37, 0.0 }
0x107c   : > { %3047 = vadd.xlane.f32.xlu1 %v3046_v39 }
0x1109   : > { %v3048_v48 = vpop.xlane.xlu1 %3047 }
0x110a   : > { %v3049_v49 = vmul.f32 0.03125, %v3048_v48 }
0x110c   : > { %v3050_v50 = vadd.f32 1e-12, %v3049_v49 }
0x110e   : > { %4116 = vrsqrt.f32 %v3050_v50 }
0x1118   : > { %v4117_v51 = vpop.eup %4116 }
0x1119   : > { %v3052_v53 = vmul.f32 %v4117_v51, %v3044_v63 }
0x111b   : > { %v3059_v55 = vmul.f32 %v3445_v52, %v3052_v53 }
0x111d   : > { %v3066_v56 = vadd.f32 %v3446_v54, %v3059_v55 }
0x111f   : > { %3864 = vmatmul.mubr.msk.f32.vlgmr.msra.gmra.mrb[28].mxu0 %vm844_vm3, %v3066_v56 }
0x11f2   : > { %v3149_v17 = vpop.f32.mrb[28].mxu0 }
0x11f3   : > { %v3150_v18 = vadd.f32 %v3452_v16, %v3149_v17  ;;  %v3865_v19 = vpop.f32.mrb[29].mxu0 }
0x11f5   : > { %v3153_v20 = vmul.f32 %v3150_v18, %v3150_v18 }
0x11f7   : > { %v3154_v21 = vmul.f32 %v3153_v20, %v3150_v18 }
0x11f9   : > { %v3155_v22 = vmul.f32 0.044715, %v3154_v21 }
0x11fb   : > { %v3156_v23 = vadd.f32 %v3155_v22, %v3150_v18 }
0x11fd   : > { %v3157_v24 = vmul.f32 0.7978846, %v3156_v23 }
0x11ff   : > { %4118 = vtanh.f32 %v3157_v24 }
0x1209   : > { %v4119_v25 = vpop.eup %4118 }
0x120a   : > { %v3159_v26 = vadd.f32 1.0, %v4119_v25 }
0x120c   : > { %v3160_v27 = vmul.f32 0.5, %v3159_v26 }
0x120e   : > { %v3161_v28 = vmul.f32 %v3160_v27, %v3150_v18 }
0x1210   : > { %3899 = vmatmul.mubr.f32.vlgmr.msra.gmra.mrb[26].mxu1 %v3161_v28 }
0x12e3   : > { %v3253_v29 = vpop.f32.mrb[26].mxu1 }
0x12e4   : > { %v3254_v30 = vadd.f32 %v3471_v3, %v3253_v29  ;;  %v3900_v31 = vpop.f32.mrb[27].mxu1 }
0x12e6   : > { %v3257_v32 = vadd.f32 %v3254_v30, %v4816_v33 }
0x12e8   : > { %v3260_v34 = vsel %vm793_vm1, %v3257_v32, 0.0 }
0x12e9   : > { %3261 = vadd.xlane.f32.xlu0 %v3260_v34 }
0x1376   : > { %v3262_v35 = vpop.xlane.xlu0 %3261 }
0x1377   : > { %v3263_v36 = vmul.f32 0.03125, %v3262_v35 }
0x1379   : > { %v3264_v63 = vsub.f32 %v3257_v32, %v3263_v36 }
0x137b   : > { %v3265_v37 = vmul.f32 %v3264_v63, %v3264_v63 }
0x137d   : > { %v3266_v39 = vsel %vm793_vm1, %v3265_v37, 0.0 }
0x137e   : > { %3267 = vadd.xlane.f32.xlu1 %v3266_v39 }
0x140b   : > { %v3268_v41 = vpop.xlane.xlu1 %3267 }
0x140c   : > { %v3269_v40 = vmul.f32 0.03125, %v3268_v41 }
0x140e   : > { %v3270_v42 = vadd.f32 1e-12, %v3269_v40 }
0x1410   : > { %4120 = vrsqrt.f32 %v3270_v42 }
0x141a   : > { %v4121_v43 = vpop.eup %4120 }
0x141b   : > { %v3272_v33 = vmul.f32 %v4121_v43, %v3264_v63 }
0x141d   : > { %v3279_v44 = vmul.f32 %v3472_v45, %v3272_v33 }
0x141f   : > { %v3286_v47 = vadd.f32 %v3473_v46, %v3279_v44 }
0x1421   : > { %3287 = vst.msk [vmem:[%s681_s1] sm:$0x1f] %vm793_vm1, %v3286_v47 }
0x1422 PF: > { %s32_s3 = sadd.s32 1, %s4128_s3  }
0x1423   : > { %p29_p4 = scmp.ge.s32.totalorder %s32_s3, 4  }
0x1425   :  { %31 = sbr.rel (!%p29_p4) target bundleno = 8 (0x8), region = 154 }

</bundles_post_ra>
